<compile_context>
chip_gen: v6e
topology: v6e:2x2x1
jax: 0.10.0
libtpu: 0.0.40
codegen_flags: <defaults>
</compile_context>

<pallas_src>
import functools

import jax
import jax.numpy as jnp
import numpy as np
from jax import lax
from jax.experimental import pallas as pl
from jax.experimental.pallas import tpu as pltpu

K = 7          # conv kernel size
KK = K * K
PAD = 3        # conv padding


def _sam_kernel(wv_ref, b_ref, x_ref, out_ref, *, H, W, use_reshape):
    # wv_ref:  (49, 2*W) VMEM f32 -- per-tap lane-packed weights [w_avg*1_W | w_max*1_W]
    # b_ref:   (1,)      SMEM f32 -- conv bias
    # x_ref:   (1, C, H*W) VMEM   -- one batch element, lane-dense
    # out_ref: (1, C, H*W) VMEM
    HW = H * W
    Wp = W + 2 * PAD
    f32 = jnp.float32

    # --- channel statistics, f32 accumulation, no full-block f32 temp -------
    avg_flat = jnp.mean(x_ref[0], axis=0, dtype=f32, keepdims=True)      # (1, HW)
    max_flat = jnp.max(x_ref[0], axis=0, keepdims=True).astype(f32)      # (1, HW)

    # --- unflatten the tiny maps to (H, W) ----------------------------------
    if use_reshape:
        avg_map = avg_flat.reshape(H, W)
        max_map = max_flat.reshape(H, W)
    else:
        avg_map = jnp.concatenate(
            [avg_flat[:, h * W:(h + 1) * W] for h in range(H)], axis=0)
        max_map = jnp.concatenate(
            [max_flat[:, h * W:(h + 1) * W] for h in range(H)], axis=0)

    # --- zero-pad to (H+6, W+6) with a couple of concats per map ------------
    zc = jnp.zeros((H, PAD), f32)
    zr = jnp.zeros((PAD, Wp), f32)

    def pad_map(m):
        m = jnp.concatenate([zc, m, zc], axis=1)
        return jnp.concatenate([zr, m, zr], axis=0)

    avg_pad = pad_map(avg_map)                                            # (Hp, Wp)
    max_pad = pad_map(max_map)

    # --- 7x7 conv (2 in-ch -> 1 out-ch), avg/max lane-packed, 49 taps -------
    # acc2[:, :W] accumulates the avg half, acc2[:, W:] the max half.
    acc2 = jnp.zeros((H, 2 * W), f32)
    for dw in range(K):
        am_col = jnp.concatenate(
            [avg_pad[:, dw:dw + W], max_pad[:, dw:dw + W]], axis=1)       # (Hp, 2W)
        for dh in range(K):
            acc2 = acc2 + wv_ref[dh * K + dw] * am_col[dh:dh + H, :]
    conv = acc2[:, :W] + acc2[:, W:] + b_ref[0]                           # (H, W) f32
    scale = jax.nn.sigmoid(conv)

    # --- re-flatten the scale, rescale x in native dtype, store lane-dense --
    if use_reshape:
        scale_flat = scale.reshape(1, HW)
    else:
        scale_flat = jnp.concatenate([scale[h:h + 1, :] for h in range(H)], axis=1)
    out_ref[0] = (x_ref[0] * scale_flat.astype(out_ref.dtype)).astype(out_ref.dtype)


def _vmem_limit_bytes(block_bytes, aux_bytes):
    try:
        cap = int(pltpu.get_tpu_info().vmem_capacity_bytes)
    except Exception:
        cap = 64 << 20          # conservative: v7x per-TensorCore VMEM
    # double-buffered in + out blocks, weight table, maps/conv scratch + slack
    need = 4 * block_bytes + aux_bytes + (4 << 20)
    return int(min(max(need, 32 << 20), (cap * 3) // 4))


def sam_block(x, weight, bias):
    """x: (N, C, H, W); weight: (1, 2, 7, 7); bias: (1,) -> (N, C, H, W)."""
    N, C, H, W = x.shape
    HW = H * W

    x_flat = x.reshape(N, C, HW)                         # free row-major reshape
    # Per-tap lane-packed weight table: row t = [w_avg[t]*ones(W) | w_max[t]*ones(W)].
    w2 = weight.reshape(2, KK).astype(jnp.float32)       # [avg taps, max taps]
    wv = jnp.concatenate(
        [jnp.repeat(w2[0][:, None], W, axis=1),
         jnp.repeat(w2[1][:, None], W, axis=1)], axis=1)  # (49, 2W) f32
    b = bias.reshape(1).astype(jnp.float32)

    block_bytes = C * HW * x.dtype.itemsize
    vmem_limit = _vmem_limit_bytes(block_bytes, wv.size * 4)

    def build(use_reshape):
        kernel = functools.partial(_sam_kernel, H=H, W=W, use_reshape=use_reshape)
        return pl.pallas_call(
            kernel,
            out_shape=jax.ShapeDtypeStruct((N, C, HW), x.dtype),
            grid_spec=pltpu.PrefetchScalarGridSpec(
                num_scalar_prefetch=0,
                grid=(N,),
                in_specs=[
                    pl.BlockSpec((KK, 2 * W), lambda n: (0, 0)),          # weight table
                    pl.BlockSpec(memory_space=pltpu.MemorySpace.SMEM),    # bias (1,)
                    pl.BlockSpec((1, C, HW), lambda n: (n, 0, 0)),        # x block
                ],
                out_specs=pl.BlockSpec((1, C, HW), lambda n: (n, 0, 0)),
            ),
            compiler_params=pltpu.CompilerParams(
                dimension_semantics=("parallel",),
                vmem_limit_bytes=vmem_limit,
            ),
        )

    try:
        out_flat = build(use_reshape=True)(wv, b, x_flat)
        out_flat = jax.block_until_ready(out_flat)
    except Exception:
        # Mosaic rejected the (1,HW)<->(H,W) reshape relayout on this build:
        # fall back to the concat-based (always-lowerable) map plumbing.
        out_flat = build(use_reshape=False)(wv, b, x_flat)

    return out_flat.reshape(N, C, H, W)


def sam_block_ref(x, weight, bias):
    """Pure-JAX reference (mirrors the PyTorch forward)."""
    avg_x = jnp.mean(x, axis=1, keepdims=True)
    max_x = jnp.max(x, axis=1, keepdims=True)
    inp = jnp.concatenate([avg_x, max_x], axis=1)               # (N, 2, H, W)
    conv = lax.conv_general_dilated(
        inp, weight, window_strides=(1, 1), padding=((PAD, PAD), (PAD, PAD)),
        dimension_numbers=("NCHW", "OIHW", "NCHW"))
    conv = conv + bias.reshape(1, 1, 1, 1)
    return x * jax.nn.sigmoid(conv)


if __name__ == "__main__":
    key = jax.random.PRNGKey(0)
    kx, kw, kb = jax.random.split(key, 3)

    N, C, H, W = 2, 4, 16, 16
    x = jax.random.normal(kx, (N, C, H, W), dtype=jnp.float32)

    # Deterministic Conv2d(2, 1, kernel_size=7) parameter init (uniform, fan_in=2*7*7).
    fan_in = 2 * K * K
    bound = 1.0 / np.sqrt(fan_in)
    weight = jax.random.uniform(kw, (1, 2, K, K), jnp.float32, -bound, bound)
    bias = jax.random.uniform(kb, (1,), jnp.float32, -bound, bound)

    out = sam_block(x, weight, bias)
    out = jax.block_until_ready(out)

    expected = sam_block_ref(x, weight, bias)
    np.testing.assert_allclose(np.asarray(out), np.asarray(expected),
                               rtol=1e-5, atol=1e-5)
    print("KERNEL_OK")
</pallas_src>

<mosaic_0001>
module attributes {stable_mosaic.version = 11 : i64} {
  func.func @_sam_kernel(%arg0: i32, %arg1: memref<49x32xf32, #tpu.memory_space<vmem>>, %arg2: memref<1xf32, #tpu.memory_space<smem>>, %arg3: memref<1x4x256xf32, #tpu.memory_space<vmem>>, %arg4: memref<1x4x256xf32, #tpu.memory_space<vmem>>) attributes {dimension_semantics = [#tpu.dimension_semantics<parallel>], iteration_bounds = array<i64: 2>, scalar_prefetch = 0 : i64, scratch_operands = 0 : i64, tpu.core_type = #tpu.core_type<tc>, window_params = [{pipeline_mode = #tpu.pipeline_mode<synchronous>, transform_indices = @transform_0, window_bounds = array<i64: 49, 32>}, {transform_indices = @transform_1, window_bounds = array<i64: 1>}, {transform_indices = @transform_2, window_bounds = array<i64: 1, 4, 256>}, {transform_indices = @transform_3, window_bounds = array<i64: 1, 4, 256>}]} {
    %c0 = arith.constant 0 : index
    %c0_0 = arith.constant 0 : index
    %c0_1 = arith.constant 0 : index
    %0 = vector.load %arg3[%c0, %c0_0, %c0_1] : memref<1x4x256xf32, #tpu.memory_space<vmem>>, vector<1x4x256xf32>
    %1 = vector.shape_cast %0 : vector<1x4x256xf32> to vector<4x256xf32>
    %cst = arith.constant dense<0.000000e+00> : vector<256xf32>
    %2 = vector.multi_reduction <add>, %1, %cst [0] : vector<4x256xf32> to vector<256xf32>
    %3 = vector.shape_cast %2 : vector<256xf32> to vector<1x256xf32>
    %cst_2 = arith.constant 4.000000e+00 : f32
    %4 = vector.broadcast %cst_2 : f32 to vector<1x256xf32>
    %5 = arith.divf %3, %4 : vector<1x256xf32>
    %c0_3 = arith.constant 0 : index
    %c0_4 = arith.constant 0 : index
    %c0_5 = arith.constant 0 : index
    %6 = vector.load %arg3[%c0_3, %c0_4, %c0_5] : memref<1x4x256xf32, #tpu.memory_space<vmem>>, vector<1x4x256xf32>
    %7 = vector.shape_cast %6 : vector<1x4x256xf32> to vector<4x256xf32>
    %cst_6 = arith.constant dense<0xFF800000> : vector<256xf32>
    %8 = vector.multi_reduction <maximumf>, %7, %cst_6 [0] : vector<4x256xf32> to vector<256xf32>
    %9 = vector.shape_cast %8 : vector<256xf32> to vector<1x256xf32>
    %10 = vector.shape_cast %5 : vector<1x256xf32> to vector<16x16xf32>
    %11 = vector.shape_cast %9 : vector<1x256xf32> to vector<16x16xf32>
    %cst_7 = arith.constant 0.000000e+00 : f32
    %12 = vector.broadcast %cst_7 : f32 to vector<16x3xf32>
    %cst_8 = arith.constant 0.000000e+00 : f32
    %13 = vector.broadcast %cst_8 : f32 to vector<3x22xf32>
    %14 = tpu.concatenate %12, %10, %12 in 1 : vector<16x3xf32>, vector<16x16xf32>, vector<16x3xf32> -> vector<16x22xf32>
    %15 = tpu.concatenate %13, %14, %13 in 0 : vector<3x22xf32>, vector<16x22xf32>, vector<3x22xf32> -> vector<22x22xf32>
    %16 = tpu.concatenate %12, %11, %12 in 1 : vector<16x3xf32>, vector<16x16xf32>, vector<16x3xf32> -> vector<16x22xf32>
    %17 = tpu.concatenate %13, %16, %13 in 0 : vector<3x22xf32>, vector<16x22xf32>, vector<3x22xf32> -> vector<22x22xf32>
    %cst_9 = arith.constant 0.000000e+00 : f32
    %18 = vector.broadcast %cst_9 : f32 to vector<16x32xf32>
    %19 = vector.extract_strided_slice %15 {offsets = [0, 0], sizes = [22, 16], strides = [1, 1]} : vector<22x22xf32> to vector<22x16xf32>
    %20 = vector.extract_strided_slice %17 {offsets = [0, 0], sizes = [22, 16], strides = [1, 1]} : vector<22x22xf32> to vector<22x16xf32>
    %21 = tpu.concatenate %19, %20 in 1 : vector<22x16xf32>, vector<22x16xf32> -> vector<22x32xf32>
    %c0_10 = arith.constant 0 : index
    %c0_11 = arith.constant 0 : index
    %22 = vector.load %arg1[%c0_10, %c0_11] : memref<49x32xf32, #tpu.memory_space<vmem>>, vector<1x32xf32>
    %23 = vector.shape_cast %22 : vector<1x32xf32> to vector<32xf32>
    %24 = vector.extract_strided_slice %21 {offsets = [0, 0], sizes = [16, 32], strides = [1, 1]} : vector<22x32xf32> to vector<16x32xf32>
    %25 = vector.shape_cast %23 : vector<32xf32> to vector<1x32xf32>
    %26 = vector.broadcast %25 : vector<1x32xf32> to vector<16x32xf32>
    %27 = arith.mulf %26, %24 : vector<16x32xf32>
    %28 = arith.addf %18, %27 : vector<16x32xf32>
    %c7 = arith.constant 7 : index
    %c0_12 = arith.constant 0 : index
    %29 = vector.load %arg1[%c7, %c0_12] : memref<49x32xf32, #tpu.memory_space<vmem>>, vector<1x32xf32>
    %30 = vector.shape_cast %29 : vector<1x32xf32> to vector<32xf32>
    %31 = vector.extract_strided_slice %21 {offsets = [1, 0], sizes = [16, 32], strides = [1, 1]} : vector<22x32xf32> to vector<16x32xf32>
    %32 = vector.shape_cast %30 : vector<32xf32> to vector<1x32xf32>
    %33 = vector.broadcast %32 : vector<1x32xf32> to vector<16x32xf32>
    %34 = arith.mulf %33, %31 : vector<16x32xf32>
    %35 = arith.addf %28, %34 : vector<16x32xf32>
    %c14 = arith.constant 14 : index
    %c0_13 = arith.constant 0 : index
    %36 = vector.load %arg1[%c14, %c0_13] : memref<49x32xf32, #tpu.memory_space<vmem>>, vector<1x32xf32>
    %37 = vector.shape_cast %36 : vector<1x32xf32> to vector<32xf32>
    %38 = vector.extract_strided_slice %21 {offsets = [2, 0], sizes = [16, 32], strides = [1, 1]} : vector<22x32xf32> to vector<16x32xf32>
    %39 = vector.shape_cast %37 : vector<32xf32> to vector<1x32xf32>
    %40 = vector.broadcast %39 : vector<1x32xf32> to vector<16x32xf32>
    %41 = arith.mulf %40, %38 : vector<16x32xf32>
    %42 = arith.addf %35, %41 : vector<16x32xf32>
    %c21 = arith.constant 21 : index
    %c0_14 = arith.constant 0 : index
    %43 = vector.load %arg1[%c21, %c0_14] : memref<49x32xf32, #tpu.memory_space<vmem>>, vector<1x32xf32>
    %44 = vector.shape_cast %43 : vector<1x32xf32> to vector<32xf32>
    %45 = vector.extract_strided_slice %21 {offsets = [3, 0], sizes = [16, 32], strides = [1, 1]} : vector<22x32xf32> to vector<16x32xf32>
    %46 = vector.shape_cast %44 : vector<32xf32> to vector<1x32xf32>
    %47 = vector.broadcast %46 : vector<1x32xf32> to vector<16x32xf32>
    %48 = arith.mulf %47, %45 : vector<16x32xf32>
    %49 = arith.addf %42, %48 : vector<16x32xf32>
    %c28 = arith.constant 28 : index
    %c0_15 = arith.constant 0 : index
    %50 = vector.load %arg1[%c28, %c0_15] : memref<49x32xf32, #tpu.memory_space<vmem>>, vector<1x32xf32>
    %51 = vector.shape_cast %50 : vector<1x32xf32> to vector<32xf32>
    %52 = vector.extract_strided_slice %21 {offsets = [4, 0], sizes = [16, 32], strides = [1, 1]} : vector<22x32xf32> to vector<16x32xf32>
    %53 = vector.shape_cast %51 : vector<32xf32> to vector<1x32xf32>
    %54 = vector.broadcast %53 : vector<1x32xf32> to vector<16x32xf32>
    %55 = arith.mulf %54, %52 : vector<16x32xf32>
    %56 = arith.addf %49, %55 : vector<16x32xf32>
    %c35 = arith.constant 35 : index
    %c0_16 = arith.constant 0 : index
    %57 = vector.load %arg1[%c35, %c0_16] : memref<49x32xf32, #tpu.memory_space<vmem>>, vector<1x32xf32>
    %58 = vector.shape_cast %57 : vector<1x32xf32> to vector<32xf32>
    %59 = vector.extract_strided_slice %21 {offsets = [5, 0], sizes = [16, 32], strides = [1, 1]} : vector<22x32xf32> to vector<16x32xf32>
    %60 = vector.shape_cast %58 : vector<32xf32> to vector<1x32xf32>
    %61 = vector.broadcast %60 : vector<1x32xf32> to vector<16x32xf32>
    %62 = arith.mulf %61, %59 : vector<16x32xf32>
    %63 = arith.addf %56, %62 : vector<16x32xf32>
    %c42 = arith.constant 42 : index
    %c0_17 = arith.constant 0 : index
    %64 = vector.load %arg1[%c42, %c0_17] : memref<49x32xf32, #tpu.memory_space<vmem>>, vector<1x32xf32>
    %65 = vector.shape_cast %64 : vector<1x32xf32> to vector<32xf32>
    %66 = vector.extract_strided_slice %21 {offsets = [6, 0], sizes = [16, 32], strides = [1, 1]} : vector<22x32xf32> to vector<16x32xf32>
    %67 = vector.shape_cast %65 : vector<32xf32> to vector<1x32xf32>
    %68 = vector.broadcast %67 : vector<1x32xf32> to vector<16x32xf32>
    %69 = arith.mulf %68, %66 : vector<16x32xf32>
    %70 = arith.addf %63, %69 : vector<16x32xf32>
    %71 = vector.extract_strided_slice %15 {offsets = [0, 1], sizes = [22, 16], strides = [1, 1]} : vector<22x22xf32> to vector<22x16xf32>
    %72 = vector.extract_strided_slice %17 {offsets = [0, 1], sizes = [22, 16], strides = [1, 1]} : vector<22x22xf32> to vector<22x16xf32>
    %73 = tpu.concatenate %71, %72 in 1 : vector<22x16xf32>, vector<22x16xf32> -> vector<22x32xf32>
    %c1 = arith.constant 1 : index
    %c0_18 = arith.constant 0 : index
    %74 = vector.load %arg1[%c1, %c0_18] : memref<49x32xf32, #tpu.memory_space<vmem>>, vector<1x32xf32>
    %75 = vector.shape_cast %74 : vector<1x32xf32> to vector<32xf32>
    %76 = vector.extract_strided_slice %73 {offsets = [0, 0], sizes = [16, 32], strides = [1, 1]} : vector<22x32xf32> to vector<16x32xf32>
    %77 = vector.shape_cast %75 : vector<32xf32> to vector<1x32xf32>
    %78 = vector.broadcast %77 : vector<1x32xf32> to vector<16x32xf32>
    %79 = arith.mulf %78, %76 : vector<16x32xf32>
    %80 = arith.addf %70, %79 : vector<16x32xf32>
    %c8 = arith.constant 8 : index
    %c0_19 = arith.constant 0 : index
    %81 = vector.load %arg1[%c8, %c0_19] : memref<49x32xf32, #tpu.memory_space<vmem>>, vector<1x32xf32>
    %82 = vector.shape_cast %81 : vector<1x32xf32> to vector<32xf32>
    %83 = vector.extract_strided_slice %73 {offsets = [1, 0], sizes = [16, 32], strides = [1, 1]} : vector<22x32xf32> to vector<16x32xf32>
    %84 = vector.shape_cast %82 : vector<32xf32> to vector<1x32xf32>
    %85 = vector.broadcast %84 : vector<1x32xf32> to vector<16x32xf32>
    %86 = arith.mulf %85, %83 : vector<16x32xf32>
    %87 = arith.addf %80, %86 : vector<16x32xf32>
    %c15 = arith.constant 15 : index
    %c0_20 = arith.constant 0 : index
    %88 = vector.load %arg1[%c15, %c0_20] : memref<49x32xf32, #tpu.memory_space<vmem>>, vector<1x32xf32>
    %89 = vector.shape_cast %88 : vector<1x32xf32> to vector<32xf32>
    %90 = vector.extract_strided_slice %73 {offsets = [2, 0], sizes = [16, 32], strides = [1, 1]} : vector<22x32xf32> to vector<16x32xf32>
    %91 = vector.shape_cast %89 : vector<32xf32> to vector<1x32xf32>
    %92 = vector.broadcast %91 : vector<1x32xf32> to vector<16x32xf32>
    %93 = arith.mulf %92, %90 : vector<16x32xf32>
    %94 = arith.addf %87, %93 : vector<16x32xf32>
    %c22 = arith.constant 22 : index
    %c0_21 = arith.constant 0 : index
    %95 = vector.load %arg1[%c22, %c0_21] : memref<49x32xf32, #tpu.memory_space<vmem>>, vector<1x32xf32>
    %96 = vector.shape_cast %95 : vector<1x32xf32> to vector<32xf32>
    %97 = vector.extract_strided_slice %73 {offsets = [3, 0], sizes = [16, 32], strides = [1, 1]} : vector<22x32xf32> to vector<16x32xf32>
    %98 = vector.shape_cast %96 : vector<32xf32> to vector<1x32xf32>
    %99 = vector.broadcast %98 : vector<1x32xf32> to vector<16x32xf32>
    %100 = arith.mulf %99, %97 : vector<16x32xf32>
    %101 = arith.addf %94, %100 : vector<16x32xf32>
    %c29 = arith.constant 29 : index
    %c0_22 = arith.constant 0 : index
    %102 = vector.load %arg1[%c29, %c0_22] : memref<49x32xf32, #tpu.memory_space<vmem>>, vector<1x32xf32>
    %103 = vector.shape_cast %102 : vector<1x32xf32> to vector<32xf32>
    %104 = vector.extract_strided_slice %73 {offsets = [4, 0], sizes = [16, 32], strides = [1, 1]} : vector<22x32xf32> to vector<16x32xf32>
    %105 = vector.shape_cast %103 : vector<32xf32> to vector<1x32xf32>
    %106 = vector.broadcast %105 : vector<1x32xf32> to vector<16x32xf32>
    %107 = arith.mulf %106, %104 : vector<16x32xf32>
    %108 = arith.addf %101, %107 : vector<16x32xf32>
    %c36 = arith.constant 36 : index
    %c0_23 = arith.constant 0 : index
    %109 = vector.load %arg1[%c36, %c0_23] : memref<49x32xf32, #tpu.memory_space<vmem>>, vector<1x32xf32>
    %110 = vector.shape_cast %109 : vector<1x32xf32> to vector<32xf32>
    %111 = vector.extract_strided_slice %73 {offsets = [5, 0], sizes = [16, 32], strides = [1, 1]} : vector<22x32xf32> to vector<16x32xf32>
    %112 = vector.shape_cast %110 : vector<32xf32> to vector<1x32xf32>
    %113 = vector.broadcast %112 : vector<1x32xf32> to vector<16x32xf32>
    %114 = arith.mulf %113, %111 : vector<16x32xf32>
    %115 = arith.addf %108, %114 : vector<16x32xf32>
    %c43 = arith.constant 43 : index
    %c0_24 = arith.constant 0 : index
    %116 = vector.load %arg1[%c43, %c0_24] : memref<49x32xf32, #tpu.memory_space<vmem>>, vector<1x32xf32>
    %117 = vector.shape_cast %116 : vector<1x32xf32> to vector<32xf32>
    %118 = vector.extract_strided_slice %73 {offsets = [6, 0], sizes = [16, 32], strides = [1, 1]} : vector<22x32xf32> to vector<16x32xf32>
    %119 = vector.shape_cast %117 : vector<32xf32> to vector<1x32xf32>
    %120 = vector.broadcast %119 : vector<1x32xf32> to vector<16x32xf32>
    %121 = arith.mulf %120, %118 : vector<16x32xf32>
    %122 = arith.addf %115, %121 : vector<16x32xf32>
    %123 = vector.extract_strided_slice %15 {offsets = [0, 2], sizes = [22, 16], strides = [1, 1]} : vector<22x22xf32> to vector<22x16xf32>
    %124 = vector.extract_strided_slice %17 {offsets = [0, 2], sizes = [22, 16], strides = [1, 1]} : vector<22x22xf32> to vector<22x16xf32>
    %125 = tpu.concatenate %123, %124 in 1 : vector<22x16xf32>, vector<22x16xf32> -> vector<22x32xf32>
    %c2 = arith.constant 2 : index
    %c0_25 = arith.constant 0 : index
    %126 = vector.load %arg1[%c2, %c0_25] : memref<49x32xf32, #tpu.memory_space<vmem>>, vector<1x32xf32>
    %127 = vector.shape_cast %126 : vector<1x32xf32> to vector<32xf32>
    %128 = vector.extract_strided_slice %125 {offsets = [0, 0], sizes = [16, 32], strides = [1, 1]} : vector<22x32xf32> to vector<16x32xf32>
    %129 = vector.shape_cast %127 : vector<32xf32> to vector<1x32xf32>
    %130 = vector.broadcast %129 : vector<1x32xf32> to vector<16x32xf32>
    %131 = arith.mulf %130, %128 : vector<16x32xf32>
    %132 = arith.addf %122, %131 : vector<16x32xf32>
    %c9 = arith.constant 9 : index
    %c0_26 = arith.constant 0 : index
    %133 = vector.load %arg1[%c9, %c0_26] : memref<49x32xf32, #tpu.memory_space<vmem>>, vector<1x32xf32>
    %134 = vector.shape_cast %133 : vector<1x32xf32> to vector<32xf32>
    %135 = vector.extract_strided_slice %125 {offsets = [1, 0], sizes = [16, 32], strides = [1, 1]} : vector<22x32xf32> to vector<16x32xf32>
    %136 = vector.shape_cast %134 : vector<32xf32> to vector<1x32xf32>
    %137 = vector.broadcast %136 : vector<1x32xf32> to vector<16x32xf32>
    %138 = arith.mulf %137, %135 : vector<16x32xf32>
    %139 = arith.addf %132, %138 : vector<16x32xf32>
    %c16 = arith.constant 16 : index
    %c0_27 = arith.constant 0 : index
    %140 = vector.load %arg1[%c16, %c0_27] : memref<49x32xf32, #tpu.memory_space<vmem>>, vector<1x32xf32>
    %141 = vector.shape_cast %140 : vector<1x32xf32> to vector<32xf32>
    %142 = vector.extract_strided_slice %125 {offsets = [2, 0], sizes = [16, 32], strides = [1, 1]} : vector<22x32xf32> to vector<16x32xf32>
    %143 = vector.shape_cast %141 : vector<32xf32> to vector<1x32xf32>
    %144 = vector.broadcast %143 : vector<1x32xf32> to vector<16x32xf32>
    %145 = arith.mulf %144, %142 : vector<16x32xf32>
    %146 = arith.addf %139, %145 : vector<16x32xf32>
    %c23 = arith.constant 23 : index
    %c0_28 = arith.constant 0 : index
    %147 = vector.load %arg1[%c23, %c0_28] : memref<49x32xf32, #tpu.memory_space<vmem>>, vector<1x32xf32>
    %148 = vector.shape_cast %147 : vector<1x32xf32> to vector<32xf32>
    %149 = vector.extract_strided_slice %125 {offsets = [3, 0], sizes = [16, 32], strides = [1, 1]} : vector<22x32xf32> to vector<16x32xf32>
    %150 = vector.shape_cast %148 : vector<32xf32> to vector<1x32xf32>
    %151 = vector.broadcast %150 : vector<1x32xf32> to vector<16x32xf32>
    %152 = arith.mulf %151, %149 : vector<16x32xf32>
    %153 = arith.addf %146, %152 : vector<16x32xf32>
    %c30 = arith.constant 30 : index
    %c0_29 = arith.constant 0 : index
    %154 = vector.load %arg1[%c30, %c0_29] : memref<49x32xf32, #tpu.memory_space<vmem>>, vector<1x32xf32>
    %155 = vector.shape_cast %154 : vector<1x32xf32> to vector<32xf32>
    %156 = vector.extract_strided_slice %125 {offsets = [4, 0], sizes = [16, 32], strides = [1, 1]} : vector<22x32xf32> to vector<16x32xf32>
    %157 = vector.shape_cast %155 : vector<32xf32> to vector<1x32xf32>
    %158 = vector.broadcast %157 : vector<1x32xf32> to vector<16x32xf32>
    %159 = arith.mulf %158, %156 : vector<16x32xf32>
    %160 = arith.addf %153, %159 : vector<16x32xf32>
    %c37 = arith.constant 37 : index
    %c0_30 = arith.constant 0 : index
    %161 = vector.load %arg1[%c37, %c0_30] : memref<49x32xf32, #tpu.memory_space<vmem>>, vector<1x32xf32>
    %162 = vector.shape_cast %161 : vector<1x32xf32> to vector<32xf32>
    %163 = vector.extract_strided_slice %125 {offsets = [5, 0], sizes = [16, 32], strides = [1, 1]} : vector<22x32xf32> to vector<16x32xf32>
    %164 = vector.shape_cast %162 : vector<32xf32> to vector<1x32xf32>
    %165 = vector.broadcast %164 : vector<1x32xf32> to vector<16x32xf32>
    %166 = arith.mulf %165, %163 : vector<16x32xf32>
    %167 = arith.addf %160, %166 : vector<16x32xf32>
    %c44 = arith.constant 44 : index
    %c0_31 = arith.constant 0 : index
    %168 = vector.load %arg1[%c44, %c0_31] : memref<49x32xf32, #tpu.memory_space<vmem>>, vector<1x32xf32>
    %169 = vector.shape_cast %168 : vector<1x32xf32> to vector<32xf32>
    %170 = vector.extract_strided_slice %125 {offsets = [6, 0], sizes = [16, 32], strides = [1, 1]} : vector<22x32xf32> to vector<16x32xf32>
    %171 = vector.shape_cast %169 : vector<32xf32> to vector<1x32xf32>
    %172 = vector.broadcast %171 : vector<1x32xf32> to vector<16x32xf32>
    %173 = arith.mulf %172, %170 : vector<16x32xf32>
    %174 = arith.addf %167, %173 : vector<16x32xf32>
    %175 = vector.extract_strided_slice %15 {offsets = [0, 3], sizes = [22, 16], strides = [1, 1]} : vector<22x22xf32> to vector<22x16xf32>
    %176 = vector.extract_strided_slice %17 {offsets = [0, 3], sizes = [22, 16], strides = [1, 1]} : vector<22x22xf32> to vector<22x16xf32>
    %177 = tpu.concatenate %175, %176 in 1 : vector<22x16xf32>, vector<22x16xf32> -> vector<22x32xf32>
    %c3 = arith.constant 3 : index
    %c0_32 = arith.constant 0 : index
    %178 = vector.load %arg1[%c3, %c0_32] : memref<49x32xf32, #tpu.memory_space<vmem>>, vector<1x32xf32>
    %179 = vector.shape_cast %178 : vector<1x32xf32> to vector<32xf32>
    %180 = vector.extract_strided_slice %177 {offsets = [0, 0], sizes = [16, 32], strides = [1, 1]} : vector<22x32xf32> to vector<16x32xf32>
    %181 = vector.shape_cast %179 : vector<32xf32> to vector<1x32xf32>
    %182 = vector.broadcast %181 : vector<1x32xf32> to vector<16x32xf32>
    %183 = arith.mulf %182, %180 : vector<16x32xf32>
    %184 = arith.addf %174, %183 : vector<16x32xf32>
    %c10 = arith.constant 10 : index
    %c0_33 = arith.constant 0 : index
    %185 = vector.load %arg1[%c10, %c0_33] : memref<49x32xf32, #tpu.memory_space<vmem>>, vector<1x32xf32>
    %186 = vector.shape_cast %185 : vector<1x32xf32> to vector<32xf32>
    %187 = vector.extract_strided_slice %177 {offsets = [1, 0], sizes = [16, 32], strides = [1, 1]} : vector<22x32xf32> to vector<16x32xf32>
    %188 = vector.shape_cast %186 : vector<32xf32> to vector<1x32xf32>
    %189 = vector.broadcast %188 : vector<1x32xf32> to vector<16x32xf32>
    %190 = arith.mulf %189, %187 : vector<16x32xf32>
    %191 = arith.addf %184, %190 : vector<16x32xf32>
    %c17 = arith.constant 17 : index
    %c0_34 = arith.constant 0 : index
    %192 = vector.load %arg1[%c17, %c0_34] : memref<49x32xf32, #tpu.memory_space<vmem>>, vector<1x32xf32>
    %193 = vector.shape_cast %192 : vector<1x32xf32> to vector<32xf32>
    %194 = vector.extract_strided_slice %177 {offsets = [2, 0], sizes = [16, 32], strides = [1, 1]} : vector<22x32xf32> to vector<16x32xf32>
    %195 = vector.shape_cast %193 : vector<32xf32> to vector<1x32xf32>
    %196 = vector.broadcast %195 : vector<1x32xf32> to vector<16x32xf32>
    %197 = arith.mulf %196, %194 : vector<16x32xf32>
    %198 = arith.addf %191, %197 : vector<16x32xf32>
    %c24 = arith.constant 24 : index
    %c0_35 = arith.constant 0 : index
    %199 = vector.load %arg1[%c24, %c0_35] : memref<49x32xf32, #tpu.memory_space<vmem>>, vector<1x32xf32>
    %200 = vector.shape_cast %199 : vector<1x32xf32> to vector<32xf32>
    %201 = vector.extract_strided_slice %177 {offsets = [3, 0], sizes = [16, 32], strides = [1, 1]} : vector<22x32xf32> to vector<16x32xf32>
    %202 = vector.shape_cast %200 : vector<32xf32> to vector<1x32xf32>
    %203 = vector.broadcast %202 : vector<1x32xf32> to vector<16x32xf32>
    %204 = arith.mulf %203, %201 : vector<16x32xf32>
    %205 = arith.addf %198, %204 : vector<16x32xf32>
    %c31 = arith.constant 31 : index
    %c0_36 = arith.constant 0 : index
    %206 = vector.load %arg1[%c31, %c0_36] : memref<49x32xf32, #tpu.memory_space<vmem>>, vector<1x32xf32>
    %207 = vector.shape_cast %206 : vector<1x32xf32> to vector<32xf32>
    %208 = vector.extract_strided_slice %177 {offsets = [4, 0], sizes = [16, 32], strides = [1, 1]} : vector<22x32xf32> to vector<16x32xf32>
    %209 = vector.shape_cast %207 : vector<32xf32> to vector<1x32xf32>
    %210 = vector.broadcast %209 : vector<1x32xf32> to vector<16x32xf32>
    %211 = arith.mulf %210, %208 : vector<16x32xf32>
    %212 = arith.addf %205, %211 : vector<16x32xf32>
    %c38 = arith.constant 38 : index
    %c0_37 = arith.constant 0 : index
    %213 = vector.load %arg1[%c38, %c0_37] : memref<49x32xf32, #tpu.memory_space<vmem>>, vector<1x32xf32>
    %214 = vector.shape_cast %213 : vector<1x32xf32> to vector<32xf32>
    %215 = vector.extract_strided_slice %177 {offsets = [5, 0], sizes = [16, 32], strides = [1, 1]} : vector<22x32xf32> to vector<16x32xf32>
    %216 = vector.shape_cast %214 : vector<32xf32> to vector<1x32xf32>
    %217 = vector.broadcast %216 : vector<1x32xf32> to vector<16x32xf32>
    %218 = arith.mulf %217, %215 : vector<16x32xf32>
    %219 = arith.addf %212, %218 : vector<16x32xf32>
    %c45 = arith.constant 45 : index
    %c0_38 = arith.constant 0 : index
    %220 = vector.load %arg1[%c45, %c0_38] : memref<49x32xf32, #tpu.memory_space<vmem>>, vector<1x32xf32>
    %221 = vector.shape_cast %220 : vector<1x32xf32> to vector<32xf32>
    %222 = vector.extract_strided_slice %177 {offsets = [6, 0], sizes = [16, 32], strides = [1, 1]} : vector<22x32xf32> to vector<16x32xf32>
    %223 = vector.shape_cast %221 : vector<32xf32> to vector<1x32xf32>
    %224 = vector.broadcast %223 : vector<1x32xf32> to vector<16x32xf32>
    %225 = arith.mulf %224, %222 : vector<16x32xf32>
    %226 = arith.addf %219, %225 : vector<16x32xf32>
    %227 = vector.extract_strided_slice %15 {offsets = [0, 4], sizes = [22, 16], strides = [1, 1]} : vector<22x22xf32> to vector<22x16xf32>
    %228 = vector.extract_strided_slice %17 {offsets = [0, 4], sizes = [22, 16], strides = [1, 1]} : vector<22x22xf32> to vector<22x16xf32>
    %229 = tpu.concatenate %227, %228 in 1 : vector<22x16xf32>, vector<22x16xf32> -> vector<22x32xf32>
    %c4 = arith.constant 4 : index
    %c0_39 = arith.constant 0 : index
    %230 = vector.load %arg1[%c4, %c0_39] : memref<49x32xf32, #tpu.memory_space<vmem>>, vector<1x32xf32>
    %231 = vector.shape_cast %230 : vector<1x32xf32> to vector<32xf32>
    %232 = vector.extract_strided_slice %229 {offsets = [0, 0], sizes = [16, 32], strides = [1, 1]} : vector<22x32xf32> to vector<16x32xf32>
    %233 = vector.shape_cast %231 : vector<32xf32> to vector<1x32xf32>
    %234 = vector.broadcast %233 : vector<1x32xf32> to vector<16x32xf32>
    %235 = arith.mulf %234, %232 : vector<16x32xf32>
    %236 = arith.addf %226, %235 : vector<16x32xf32>
    %c11 = arith.constant 11 : index
    %c0_40 = arith.constant 0 : index
    %237 = vector.load %arg1[%c11, %c0_40] : memref<49x32xf32, #tpu.memory_space<vmem>>, vector<1x32xf32>
    %238 = vector.shape_cast %237 : vector<1x32xf32> to vector<32xf32>
    %239 = vector.extract_strided_slice %229 {offsets = [1, 0], sizes = [16, 32], strides = [1, 1]} : vector<22x32xf32> to vector<16x32xf32>
    %240 = vector.shape_cast %238 : vector<32xf32> to vector<1x32xf32>
    %241 = vector.broadcast %240 : vector<1x32xf32> to vector<16x32xf32>
    %242 = arith.mulf %241, %239 : vector<16x32xf32>
    %243 = arith.addf %236, %242 : vector<16x32xf32>
    %c18 = arith.constant 18 : index
    %c0_41 = arith.constant 0 : index
    %244 = vector.load %arg1[%c18, %c0_41] : memref<49x32xf32, #tpu.memory_space<vmem>>, vector<1x32xf32>
    %245 = vector.shape_cast %244 : vector<1x32xf32> to vector<32xf32>
    %246 = vector.extract_strided_slice %229 {offsets = [2, 0], sizes = [16, 32], strides = [1, 1]} : vector<22x32xf32> to vector<16x32xf32>
    %247 = vector.shape_cast %245 : vector<32xf32> to vector<1x32xf32>
    %248 = vector.broadcast %247 : vector<1x32xf32> to vector<16x32xf32>
    %249 = arith.mulf %248, %246 : vector<16x32xf32>
    %250 = arith.addf %243, %249 : vector<16x32xf32>
    %c25 = arith.constant 25 : index
    %c0_42 = arith.constant 0 : index
    %251 = vector.load %arg1[%c25, %c0_42] : memref<49x32xf32, #tpu.memory_space<vmem>>, vector<1x32xf32>
    %252 = vector.shape_cast %251 : vector<1x32xf32> to vector<32xf32>
    %253 = vector.extract_strided_slice %229 {offsets = [3, 0], sizes = [16, 32], strides = [1, 1]} : vector<22x32xf32> to vector<16x32xf32>
    %254 = vector.shape_cast %252 : vector<32xf32> to vector<1x32xf32>
    %255 = vector.broadcast %254 : vector<1x32xf32> to vector<16x32xf32>
    %256 = arith.mulf %255, %253 : vector<16x32xf32>
    %257 = arith.addf %250, %256 : vector<16x32xf32>
    %c32 = arith.constant 32 : index
    %c0_43 = arith.constant 0 : index
    %258 = vector.load %arg1[%c32, %c0_43] : memref<49x32xf32, #tpu.memory_space<vmem>>, vector<1x32xf32>
    %259 = vector.shape_cast %258 : vector<1x32xf32> to vector<32xf32>
    %260 = vector.extract_strided_slice %229 {offsets = [4, 0], sizes = [16, 32], strides = [1, 1]} : vector<22x32xf32> to vector<16x32xf32>
    %261 = vector.shape_cast %259 : vector<32xf32> to vector<1x32xf32>
    %262 = vector.broadcast %261 : vector<1x32xf32> to vector<16x32xf32>
    %263 = arith.mulf %262, %260 : vector<16x32xf32>
    %264 = arith.addf %257, %263 : vector<16x32xf32>
    %c39 = arith.constant 39 : index
    %c0_44 = arith.constant 0 : index
    %265 = vector.load %arg1[%c39, %c0_44] : memref<49x32xf32, #tpu.memory_space<vmem>>, vector<1x32xf32>
    %266 = vector.shape_cast %265 : vector<1x32xf32> to vector<32xf32>
    %267 = vector.extract_strided_slice %229 {offsets = [5, 0], sizes = [16, 32], strides = [1, 1]} : vector<22x32xf32> to vector<16x32xf32>
    %268 = vector.shape_cast %266 : vector<32xf32> to vector<1x32xf32>
    %269 = vector.broadcast %268 : vector<1x32xf32> to vector<16x32xf32>
    %270 = arith.mulf %269, %267 : vector<16x32xf32>
    %271 = arith.addf %264, %270 : vector<16x32xf32>
    %c46 = arith.constant 46 : index
    %c0_45 = arith.constant 0 : index
    %272 = vector.load %arg1[%c46, %c0_45] : memref<49x32xf32, #tpu.memory_space<vmem>>, vector<1x32xf32>
    %273 = vector.shape_cast %272 : vector<1x32xf32> to vector<32xf32>
    %274 = vector.extract_strided_slice %229 {offsets = [6, 0], sizes = [16, 32], strides = [1, 1]} : vector<22x32xf32> to vector<16x32xf32>
    %275 = vector.shape_cast %273 : vector<32xf32> to vector<1x32xf32>
    %276 = vector.broadcast %275 : vector<1x32xf32> to vector<16x32xf32>
    %277 = arith.mulf %276, %274 : vector<16x32xf32>
    %278 = arith.addf %271, %277 : vector<16x32xf32>
    %279 = vector.extract_strided_slice %15 {offsets = [0, 5], sizes = [22, 16], strides = [1, 1]} : vector<22x22xf32> to vector<22x16xf32>
    %280 = vector.extract_strided_slice %17 {offsets = [0, 5], sizes = [22, 16], strides = [1, 1]} : vector<22x22xf32> to vector<22x16xf32>
    %281 = tpu.concatenate %279, %280 in 1 : vector<22x16xf32>, vector<22x16xf32> -> vector<22x32xf32>
    %c5 = arith.constant 5 : index
    %c0_46 = arith.constant 0 : index
    %282 = vector.load %arg1[%c5, %c0_46] : memref<49x32xf32, #tpu.memory_space<vmem>>, vector<1x32xf32>
    %283 = vector.shape_cast %282 : vector<1x32xf32> to vector<32xf32>
    %284 = vector.extract_strided_slice %281 {offsets = [0, 0], sizes = [16, 32], strides = [1, 1]} : vector<22x32xf32> to vector<16x32xf32>
    %285 = vector.shape_cast %283 : vector<32xf32> to vector<1x32xf32>
    %286 = vector.broadcast %285 : vector<1x32xf32> to vector<16x32xf32>
    %287 = arith.mulf %286, %284 : vector<16x32xf32>
    %288 = arith.addf %278, %287 : vector<16x32xf32>
    %c12 = arith.constant 12 : index
    %c0_47 = arith.constant 0 : index
    %289 = vector.load %arg1[%c12, %c0_47] : memref<49x32xf32, #tpu.memory_space<vmem>>, vector<1x32xf32>
    %290 = vector.shape_cast %289 : vector<1x32xf32> to vector<32xf32>
    %291 = vector.extract_strided_slice %281 {offsets = [1, 0], sizes = [16, 32], strides = [1, 1]} : vector<22x32xf32> to vector<16x32xf32>
    %292 = vector.shape_cast %290 : vector<32xf32> to vector<1x32xf32>
    %293 = vector.broadcast %292 : vector<1x32xf32> to vector<16x32xf32>
    %294 = arith.mulf %293, %291 : vector<16x32xf32>
    %295 = arith.addf %288, %294 : vector<16x32xf32>
    %c19 = arith.constant 19 : index
    %c0_48 = arith.constant 0 : index
    %296 = vector.load %arg1[%c19, %c0_48] : memref<49x32xf32, #tpu.memory_space<vmem>>, vector<1x32xf32>
    %297 = vector.shape_cast %296 : vector<1x32xf32> to vector<32xf32>
    %298 = vector.extract_strided_slice %281 {offsets = [2, 0], sizes = [16, 32], strides = [1, 1]} : vector<22x32xf32> to vector<16x32xf32>
    %299 = vector.shape_cast %297 : vector<32xf32> to vector<1x32xf32>
    %300 = vector.broadcast %299 : vector<1x32xf32> to vector<16x32xf32>
    %301 = arith.mulf %300, %298 : vector<16x32xf32>
    %302 = arith.addf %295, %301 : vector<16x32xf32>
    %c26 = arith.constant 26 : index
    %c0_49 = arith.constant 0 : index
    %303 = vector.load %arg1[%c26, %c0_49] : memref<49x32xf32, #tpu.memory_space<vmem>>, vector<1x32xf32>
    %304 = vector.shape_cast %303 : vector<1x32xf32> to vector<32xf32>
    %305 = vector.extract_strided_slice %281 {offsets = [3, 0], sizes = [16, 32], strides = [1, 1]} : vector<22x32xf32> to vector<16x32xf32>
    %306 = vector.shape_cast %304 : vector<32xf32> to vector<1x32xf32>
    %307 = vector.broadcast %306 : vector<1x32xf32> to vector<16x32xf32>
    %308 = arith.mulf %307, %305 : vector<16x32xf32>
    %309 = arith.addf %302, %308 : vector<16x32xf32>
    %c33 = arith.constant 33 : index
    %c0_50 = arith.constant 0 : index
    %310 = vector.load %arg1[%c33, %c0_50] : memref<49x32xf32, #tpu.memory_space<vmem>>, vector<1x32xf32>
    %311 = vector.shape_cast %310 : vector<1x32xf32> to vector<32xf32>
    %312 = vector.extract_strided_slice %281 {offsets = [4, 0], sizes = [16, 32], strides = [1, 1]} : vector<22x32xf32> to vector<16x32xf32>
    %313 = vector.shape_cast %311 : vector<32xf32> to vector<1x32xf32>
    %314 = vector.broadcast %313 : vector<1x32xf32> to vector<16x32xf32>
    %315 = arith.mulf %314, %312 : vector<16x32xf32>
    %316 = arith.addf %309, %315 : vector<16x32xf32>
    %c40 = arith.constant 40 : index
    %c0_51 = arith.constant 0 : index
    %317 = vector.load %arg1[%c40, %c0_51] : memref<49x32xf32, #tpu.memory_space<vmem>>, vector<1x32xf32>
    %318 = vector.shape_cast %317 : vector<1x32xf32> to vector<32xf32>
    %319 = vector.extract_strided_slice %281 {offsets = [5, 0], sizes = [16, 32], strides = [1, 1]} : vector<22x32xf32> to vector<16x32xf32>
    %320 = vector.shape_cast %318 : vector<32xf32> to vector<1x32xf32>
    %321 = vector.broadcast %320 : vector<1x32xf32> to vector<16x32xf32>
    %322 = arith.mulf %321, %319 : vector<16x32xf32>
    %323 = arith.addf %316, %322 : vector<16x32xf32>
    %c47 = arith.constant 47 : index
    %c0_52 = arith.constant 0 : index
    %324 = vector.load %arg1[%c47, %c0_52] : memref<49x32xf32, #tpu.memory_space<vmem>>, vector<1x32xf32>
    %325 = vector.shape_cast %324 : vector<1x32xf32> to vector<32xf32>
    %326 = vector.extract_strided_slice %281 {offsets = [6, 0], sizes = [16, 32], strides = [1, 1]} : vector<22x32xf32> to vector<16x32xf32>
    %327 = vector.shape_cast %325 : vector<32xf32> to vector<1x32xf32>
    %328 = vector.broadcast %327 : vector<1x32xf32> to vector<16x32xf32>
    %329 = arith.mulf %328, %326 : vector<16x32xf32>
    %330 = arith.addf %323, %329 : vector<16x32xf32>
    %331 = vector.extract_strided_slice %15 {offsets = [0, 6], sizes = [22, 16], strides = [1, 1]} : vector<22x22xf32> to vector<22x16xf32>
    %332 = vector.extract_strided_slice %17 {offsets = [0, 6], sizes = [22, 16], strides = [1, 1]} : vector<22x22xf32> to vector<22x16xf32>
    %333 = tpu.concatenate %331, %332 in 1 : vector<22x16xf32>, vector<22x16xf32> -> vector<22x32xf32>
    %c6 = arith.constant 6 : index
    %c0_53 = arith.constant 0 : index
    %334 = vector.load %arg1[%c6, %c0_53] : memref<49x32xf32, #tpu.memory_space<vmem>>, vector<1x32xf32>
    %335 = vector.shape_cast %334 : vector<1x32xf32> to vector<32xf32>
    %336 = vector.extract_strided_slice %333 {offsets = [0, 0], sizes = [16, 32], strides = [1, 1]} : vector<22x32xf32> to vector<16x32xf32>
    %337 = vector.shape_cast %335 : vector<32xf32> to vector<1x32xf32>
    %338 = vector.broadcast %337 : vector<1x32xf32> to vector<16x32xf32>
    %339 = arith.mulf %338, %336 : vector<16x32xf32>
    %340 = arith.addf %330, %339 : vector<16x32xf32>
    %c13 = arith.constant 13 : index
    %c0_54 = arith.constant 0 : index
    %341 = vector.load %arg1[%c13, %c0_54] : memref<49x32xf32, #tpu.memory_space<vmem>>, vector<1x32xf32>
    %342 = vector.shape_cast %341 : vector<1x32xf32> to vector<32xf32>
    %343 = vector.extract_strided_slice %333 {offsets = [1, 0], sizes = [16, 32], strides = [1, 1]} : vector<22x32xf32> to vector<16x32xf32>
    %344 = vector.shape_cast %342 : vector<32xf32> to vector<1x32xf32>
    %345 = vector.broadcast %344 : vector<1x32xf32> to vector<16x32xf32>
    %346 = arith.mulf %345, %343 : vector<16x32xf32>
    %347 = arith.addf %340, %346 : vector<16x32xf32>
    %c20 = arith.constant 20 : index
    %c0_55 = arith.constant 0 : index
    %348 = vector.load %arg1[%c20, %c0_55] : memref<49x32xf32, #tpu.memory_space<vmem>>, vector<1x32xf32>
    %349 = vector.shape_cast %348 : vector<1x32xf32> to vector<32xf32>
    %350 = vector.extract_strided_slice %333 {offsets = [2, 0], sizes = [16, 32], strides = [1, 1]} : vector<22x32xf32> to vector<16x32xf32>
    %351 = vector.shape_cast %349 : vector<32xf32> to vector<1x32xf32>
    %352 = vector.broadcast %351 : vector<1x32xf32> to vector<16x32xf32>
    %353 = arith.mulf %352, %350 : vector<16x32xf32>
    %354 = arith.addf %347, %353 : vector<16x32xf32>
    %c27 = arith.constant 27 : index
    %c0_56 = arith.constant 0 : index
    %355 = vector.load %arg1[%c27, %c0_56] : memref<49x32xf32, #tpu.memory_space<vmem>>, vector<1x32xf32>
    %356 = vector.shape_cast %355 : vector<1x32xf32> to vector<32xf32>
    %357 = vector.extract_strided_slice %333 {offsets = [3, 0], sizes = [16, 32], strides = [1, 1]} : vector<22x32xf32> to vector<16x32xf32>
    %358 = vector.shape_cast %356 : vector<32xf32> to vector<1x32xf32>
    %359 = vector.broadcast %358 : vector<1x32xf32> to vector<16x32xf32>
    %360 = arith.mulf %359, %357 : vector<16x32xf32>
    %361 = arith.addf %354, %360 : vector<16x32xf32>
    %c34 = arith.constant 34 : index
    %c0_57 = arith.constant 0 : index
    %362 = vector.load %arg1[%c34, %c0_57] : memref<49x32xf32, #tpu.memory_space<vmem>>, vector<1x32xf32>
    %363 = vector.shape_cast %362 : vector<1x32xf32> to vector<32xf32>
    %364 = vector.extract_strided_slice %333 {offsets = [4, 0], sizes = [16, 32], strides = [1, 1]} : vector<22x32xf32> to vector<16x32xf32>
    %365 = vector.shape_cast %363 : vector<32xf32> to vector<1x32xf32>
    %366 = vector.broadcast %365 : vector<1x32xf32> to vector<16x32xf32>
    %367 = arith.mulf %366, %364 : vector<16x32xf32>
    %368 = arith.addf %361, %367 : vector<16x32xf32>
    %c41 = arith.constant 41 : index
    %c0_58 = arith.constant 0 : index
    %369 = vector.load %arg1[%c41, %c0_58] : memref<49x32xf32, #tpu.memory_space<vmem>>, vector<1x32xf32>
    %370 = vector.shape_cast %369 : vector<1x32xf32> to vector<32xf32>
    %371 = vector.extract_strided_slice %333 {offsets = [5, 0], sizes = [16, 32], strides = [1, 1]} : vector<22x32xf32> to vector<16x32xf32>
    %372 = vector.shape_cast %370 : vector<32xf32> to vector<1x32xf32>
    %373 = vector.broadcast %372 : vector<1x32xf32> to vector<16x32xf32>
    %374 = arith.mulf %373, %371 : vector<16x32xf32>
    %375 = arith.addf %368, %374 : vector<16x32xf32>
    %c48 = arith.constant 48 : index
    %c0_59 = arith.constant 0 : index
    %376 = vector.load %arg1[%c48, %c0_59] : memref<49x32xf32, #tpu.memory_space<vmem>>, vector<1x32xf32>
    %377 = vector.shape_cast %376 : vector<1x32xf32> to vector<32xf32>
    %378 = vector.extract_strided_slice %333 {offsets = [6, 0], sizes = [16, 32], strides = [1, 1]} : vector<22x32xf32> to vector<16x32xf32>
    %379 = vector.shape_cast %377 : vector<32xf32> to vector<1x32xf32>
    %380 = vector.broadcast %379 : vector<1x32xf32> to vector<16x32xf32>
    %381 = arith.mulf %380, %378 : vector<16x32xf32>
    %382 = arith.addf %375, %381 : vector<16x32xf32>
    %383 = vector.extract_strided_slice %382 {offsets = [0, 0], sizes = [16, 16], strides = [1, 1]} : vector<16x32xf32> to vector<16x16xf32>
    %384 = vector.extract_strided_slice %382 {offsets = [0, 16], sizes = [16, 16], strides = [1, 1]} : vector<16x32xf32> to vector<16x16xf32>
    %385 = arith.addf %383, %384 : vector<16x16xf32>
    %c0_60 = arith.constant 0 : index
    %386 = memref.load %arg2[%c0_60] : memref<1xf32, #tpu.memory_space<smem>>
    %387 = vector.broadcast %386 : f32 to vector<16x16xf32>
    %388 = arith.addf %385, %387 : vector<16x16xf32>
    %389 = arith.negf %388 : vector<16x16xf32>
    %390 = math.exp %389 : vector<16x16xf32>
    %cst_61 = arith.constant 1.000000e+00 : f32
    %391 = vector.broadcast %cst_61 : f32 to vector<16x16xf32>
    %392 = arith.addf %391, %390 : vector<16x16xf32>
    %393 = arith.divf %391, %392 : vector<16x16xf32>
    %394 = vector.shape_cast %393 : vector<16x16xf32> to vector<1x256xf32>
    %c0_62 = arith.constant 0 : index
    %c0_63 = arith.constant 0 : index
    %c0_64 = arith.constant 0 : index
    %395 = vector.load %arg3[%c0_62, %c0_63, %c0_64] : memref<1x4x256xf32, #tpu.memory_space<vmem>>, vector<1x4x256xf32>
    %396 = vector.shape_cast %395 : vector<1x4x256xf32> to vector<4x256xf32>
    %397 = vector.broadcast %394 : vector<1x256xf32> to vector<4x256xf32>
    %398 = arith.mulf %396, %397 : vector<4x256xf32>
    %c0_65 = arith.constant 0 : index
    %c0_66 = arith.constant 0 : index
    %c0_67 = arith.constant 0 : index
    %399 = vector.load %arg4[%c0_65, %c0_66, %c0_67] : memref<1x4x256xf32, #tpu.memory_space<vmem>>, vector<1x4x256xf32>
    %400 = vector.shape_cast %399 : vector<1x4x256xf32> to vector<4x256xf32>
    %401 = vector.shape_cast %398 : vector<4x256xf32> to vector<1x4x256xf32>
    tpu.vector_store %arg4[%c0_65, %c0_66, %c0_67], %401 {strides = array<i32>} : memref<1x4x256xf32, #tpu.memory_space<vmem>>, vector<1x4x256xf32>,
    return
  }
  func.func @transform_0(%arg0: i32) -> (i32, i32) {
    %c0_i32 = arith.constant 0 : i32
    %c0_i32_0 = arith.constant 0 : i32
    %c0_i32_1 = arith.constant 0 : i32
    return %c0_i32, %c0_i32_0 : i32, i32
  }
  func.func @transform_1(%arg0: i32) -> i32 {
    %c0_i32 = arith.constant 0 : i32
    %c0_i32_0 = arith.constant 0 : i32
    return %c0_i32 : i32
  }
  func.func @transform_2(%arg0: i32) -> (i32, i32, i32) {
    %c0_i32 = arith.constant 0 : i32
    %c0_i32_0 = arith.constant 0 : i32
    %c0_i32_1 = arith.constant 0 : i32
    return %arg0, %c0_i32, %c0_i32_0 : i32, i32, i32
  }
  func.func @transform_3(%arg0: i32) -> (i32, i32, i32) {
    %c0_i32 = arith.constant 0 : i32
    %c0_i32_0 = arith.constant 0 : i32
    %c0_i32_1 = arith.constant 0 : i32
    return %arg0, %c0_i32, %c0_i32_0 : i32, i32, i32
  }
}

module attributes {stable_mosaic.version = 11 : i64} {
  func.func @_sam_kernel(%arg0: i32, %arg1: memref<49x32xf32, #tpu.memory_space<vmem>>, %arg2: memref<1xf32, #tpu.memory_space<smem>>, %arg3: memref<1x4x256xf32, #tpu.memory_space<vmem>>, %arg4: memref<1x4x256xf32, #tpu.memory_space<vmem>>) attributes {dimension_semantics = [#tpu.dimension_semantics<parallel>], iteration_bounds = array<i64: 2>, scalar_prefetch = 0 : i64, scratch_operands = 0 : i64, tpu.core_type = #tpu.core_type<tc>, window_params = [{pipeline_mode = #tpu.pipeline_mode<synchronous>, transform_indices = @transform_0, window_bounds = array<i64: 49, 32>}, {transform_indices = @transform_1, window_bounds = array<i64: 1>}, {transform_indices = @transform_2, window_bounds = array<i64: 1, 4, 256>}, {transform_indices = @transform_3, window_bounds = array<i64: 1, 4, 256>}]} {
    %c0 = arith.constant 0 : index
    %c0_0 = arith.constant 0 : index
    %c0_1 = arith.constant 0 : index
    %0 = vector.load %arg3[%c0, %c0_0, %c0_1] : memref<1x4x256xf32, #tpu.memory_space<vmem>>, vector<1x4x256xf32>
    %1 = vector.shape_cast %0 : vector<1x4x256xf32> to vector<4x256xf32>
    %cst = arith.constant dense<0.000000e+00> : vector<256xf32>
    %2 = vector.multi_reduction <add>, %1, %cst [0] : vector<4x256xf32> to vector<256xf32>
    %3 = vector.shape_cast %2 : vector<256xf32> to vector<1x256xf32>
    %cst_2 = arith.constant 4.000000e+00 : f32
    %4 = vector.broadcast %cst_2 : f32 to vector<1x256xf32>
    %5 = arith.divf %3, %4 : vector<1x256xf32>
    %c0_3 = arith.constant 0 : index
    %c0_4 = arith.constant 0 : index
    %c0_5 = arith.constant 0 : index
    %6 = vector.load %arg3[%c0_3, %c0_4, %c0_5] : memref<1x4x256xf32, #tpu.memory_space<vmem>>, vector<1x4x256xf32>
    %7 = vector.shape_cast %6 : vector<1x4x256xf32> to vector<4x256xf32>
    %cst_6 = arith.constant dense<0xFF800000> : vector<256xf32>
    %8 = vector.multi_reduction <maximumf>, %7, %cst_6 [0] : vector<4x256xf32> to vector<256xf32>
    %9 = vector.shape_cast %8 : vector<256xf32> to vector<1x256xf32>
    %10 = vector.extract_strided_slice %5 {offsets = [0, 0], sizes = [1, 16], strides = [1, 1]} : vector<1x256xf32> to vector<1x16xf32>
    %11 = vector.extract_strided_slice %5 {offsets = [0, 16], sizes = [1, 16], strides = [1, 1]} : vector<1x256xf32> to vector<1x16xf32>
    %12 = vector.extract_strided_slice %5 {offsets = [0, 32], sizes = [1, 16], strides = [1, 1]} : vector<1x256xf32> to vector<1x16xf32>
    %13 = vector.extract_strided_slice %5 {offsets = [0, 48], sizes = [1, 16], strides = [1, 1]} : vector<1x256xf32> to vector<1x16xf32>
    %14 = vector.extract_strided_slice %5 {offsets = [0, 64], sizes = [1, 16], strides = [1, 1]} : vector<1x256xf32> to vector<1x16xf32>
    %15 = vector.extract_strided_slice %5 {offsets = [0, 80], sizes = [1, 16], strides = [1, 1]} : vector<1x256xf32> to vector<1x16xf32>
    %16 = vector.extract_strided_slice %5 {offsets = [0, 96], sizes = [1, 16], strides = [1, 1]} : vector<1x256xf32> to vector<1x16xf32>
    %17 = vector.extract_strided_slice %5 {offsets = [0, 112], sizes = [1, 16], strides = [1, 1]} : vector<1x256xf32> to vector<1x16xf32>
    %18 = vector.extract_strided_slice %5 {offsets = [0, 128], sizes = [1, 16], strides = [1, 1]} : vector<1x256xf32> to vector<1x16xf32>
    %19 = vector.extract_strided_slice %5 {offsets = [0, 144], sizes = [1, 16], strides = [1, 1]} : vector<1x256xf32> to vector<1x16xf32>
    %20 = vector.extract_strided_slice %5 {offsets = [0, 160], sizes = [1, 16], strides = [1, 1]} : vector<1x256xf32> to vector<1x16xf32>
    %21 = vector.extract_strided_slice %5 {offsets = [0, 176], sizes = [1, 16], strides = [1, 1]} : vector<1x256xf32> to vector<1x16xf32>
    %22 = vector.extract_strided_slice %5 {offsets = [0, 192], sizes = [1, 16], strides = [1, 1]} : vector<1x256xf32> to vector<1x16xf32>
    %23 = vector.extract_strided_slice %5 {offsets = [0, 208], sizes = [1, 16], strides = [1, 1]} : vector<1x256xf32> to vector<1x16xf32>
    %24 = vector.extract_strided_slice %5 {offsets = [0, 224], sizes = [1, 16], strides = [1, 1]} : vector<1x256xf32> to vector<1x16xf32>
    %25 = vector.extract_strided_slice %5 {offsets = [0, 240], sizes = [1, 16], strides = [1, 1]} : vector<1x256xf32> to vector<1x16xf32>
    %26 = tpu.concatenate %10, %11, %12, %13, %14, %15, %16, %17, %18, %19, %20, %21, %22, %23, %24, %25 in 0 : vector<1x16xf32>, vector<1x16xf32>, vector<1x16xf32>, vector<1x16xf32>, vector<1x16xf32>, vector<1x16xf32>, vector<1x16xf32>, vector<1x16xf32>, vector<1x16xf32>, vector<1x16xf32>, vector<1x16xf32>, vector<1x16xf32>, vector<1x16xf32>, vector<1x16xf32>, vector<1x16xf32>, vector<1x16xf32> -> vector<16x16xf32>
    %27 = vector.extract_strided_slice %9 {offsets = [0, 0], sizes = [1, 16], strides = [1, 1]} : vector<1x256xf32> to vector<1x16xf32>
    %28 = vector.extract_strided_slice %9 {offsets = [0, 16], sizes = [1, 16], strides = [1, 1]} : vector<1x256xf32> to vector<1x16xf32>
    %29 = vector.extract_strided_slice %9 {offsets = [0, 32], sizes = [1, 16], strides = [1, 1]} : vector<1x256xf32> to vector<1x16xf32>
    %30 = vector.extract_strided_slice %9 {offsets = [0, 48], sizes = [1, 16], strides = [1, 1]} : vector<1x256xf32> to vector<1x16xf32>
    %31 = vector.extract_strided_slice %9 {offsets = [0, 64], sizes = [1, 16], strides = [1, 1]} : vector<1x256xf32> to vector<1x16xf32>
    %32 = vector.extract_strided_slice %9 {offsets = [0, 80], sizes = [1, 16], strides = [1, 1]} : vector<1x256xf32> to vector<1x16xf32>
    %33 = vector.extract_strided_slice %9 {offsets = [0, 96], sizes = [1, 16], strides = [1, 1]} : vector<1x256xf32> to vector<1x16xf32>
    %34 = vector.extract_strided_slice %9 {offsets = [0, 112], sizes = [1, 16], strides = [1, 1]} : vector<1x256xf32> to vector<1x16xf32>
    %35 = vector.extract_strided_slice %9 {offsets = [0, 128], sizes = [1, 16], strides = [1, 1]} : vector<1x256xf32> to vector<1x16xf32>
    %36 = vector.extract_strided_slice %9 {offsets = [0, 144], sizes = [1, 16], strides = [1, 1]} : vector<1x256xf32> to vector<1x16xf32>
    %37 = vector.extract_strided_slice %9 {offsets = [0, 160], sizes = [1, 16], strides = [1, 1]} : vector<1x256xf32> to vector<1x16xf32>
    %38 = vector.extract_strided_slice %9 {offsets = [0, 176], sizes = [1, 16], strides = [1, 1]} : vector<1x256xf32> to vector<1x16xf32>
    %39 = vector.extract_strided_slice %9 {offsets = [0, 192], sizes = [1, 16], strides = [1, 1]} : vector<1x256xf32> to vector<1x16xf32>
    %40 = vector.extract_strided_slice %9 {offsets = [0, 208], sizes = [1, 16], strides = [1, 1]} : vector<1x256xf32> to vector<1x16xf32>
    %41 = vector.extract_strided_slice %9 {offsets = [0, 224], sizes = [1, 16], strides = [1, 1]} : vector<1x256xf32> to vector<1x16xf32>
    %42 = vector.extract_strided_slice %9 {offsets = [0, 240], sizes = [1, 16], strides = [1, 1]} : vector<1x256xf32> to vector<1x16xf32>
    %43 = tpu.concatenate %27, %28, %29, %30, %31, %32, %33, %34, %35, %36, %37, %38, %39, %40, %41, %42 in 0 : vector<1x16xf32>, vector<1x16xf32>, vector<1x16xf32>, vector<1x16xf32>, vector<1x16xf32>, vector<1x16xf32>, vector<1x16xf32>, vector<1x16xf32>, vector<1x16xf32>, vector<1x16xf32>, vector<1x16xf32>, vector<1x16xf32>, vector<1x16xf32>, vector<1x16xf32>, vector<1x16xf32>, vector<1x16xf32> -> vector<16x16xf32>
    %cst_7 = arith.constant 0.000000e+00 : f32
    %44 = vector.broadcast %cst_7 : f32 to vector<16x3xf32>
    %cst_8 = arith.constant 0.000000e+00 : f32
    %45 = vector.broadcast %cst_8 : f32 to vector<3x22xf32>
    %46 = tpu.concatenate %44, %26, %44 in 1 : vector<16x3xf32>, vector<16x16xf32>, vector<16x3xf32> -> vector<16x22xf32>
    %47 = tpu.concatenate %45, %46, %45 in 0 : vector<3x22xf32>, vector<16x22xf32>, vector<3x22xf32> -> vector<22x22xf32>
    %48 = tpu.concatenate %44, %43, %44 in 1 : vector<16x3xf32>, vector<16x16xf32>, vector<16x3xf32> -> vector<16x22xf32>
    %49 = tpu.concatenate %45, %48, %45 in 0 : vector<3x22xf32>, vector<16x22xf32>, vector<3x22xf32> -> vector<22x22xf32>
    %cst_9 = arith.constant 0.000000e+00 : f32
    %50 = vector.broadcast %cst_9 : f32 to vector<16x32xf32>
    %51 = vector.extract_strided_slice %47 {offsets = [0, 0], sizes = [22, 16], strides = [1, 1]} : vector<22x22xf32> to vector<22x16xf32>
    %52 = vector.extract_strided_slice %49 {offsets = [0, 0], sizes = [22, 16], strides = [1, 1]} : vector<22x22xf32> to vector<22x16xf32>
    %53 = tpu.concatenate %51, %52 in 1 : vector<22x16xf32>, vector<22x16xf32> -> vector<22x32xf32>
    %c0_10 = arith.constant 0 : index
    %c0_11 = arith.constant 0 : index
    %54 = vector.load %arg1[%c0_10, %c0_11] : memref<49x32xf32, #tpu.memory_space<vmem>>, vector<1x32xf32>
    %55 = vector.shape_cast %54 : vector<1x32xf32> to vector<32xf32>
    %56 = vector.extract_strided_slice %53 {offsets = [0, 0], sizes = [16, 32], strides = [1, 1]} : vector<22x32xf32> to vector<16x32xf32>
    %57 = vector.shape_cast %55 : vector<32xf32> to vector<1x32xf32>
    %58 = vector.broadcast %57 : vector<1x32xf32> to vector<16x32xf32>
    %59 = arith.mulf %58, %56 : vector<16x32xf32>
    %60 = arith.addf %50, %59 : vector<16x32xf32>
    %c7 = arith.constant 7 : index
    %c0_12 = arith.constant 0 : index
    %61 = vector.load %arg1[%c7, %c0_12] : memref<49x32xf32, #tpu.memory_space<vmem>>, vector<1x32xf32>
    %62 = vector.shape_cast %61 : vector<1x32xf32> to vector<32xf32>
    %63 = vector.extract_strided_slice %53 {offsets = [1, 0], sizes = [16, 32], strides = [1, 1]} : vector<22x32xf32> to vector<16x32xf32>
    %64 = vector.shape_cast %62 : vector<32xf32> to vector<1x32xf32>
    %65 = vector.broadcast %64 : vector<1x32xf32> to vector<16x32xf32>
    %66 = arith.mulf %65, %63 : vector<16x32xf32>
    %67 = arith.addf %60, %66 : vector<16x32xf32>
    %c14 = arith.constant 14 : index
    %c0_13 = arith.constant 0 : index
    %68 = vector.load %arg1[%c14, %c0_13] : memref<49x32xf32, #tpu.memory_space<vmem>>, vector<1x32xf32>
    %69 = vector.shape_cast %68 : vector<1x32xf32> to vector<32xf32>
    %70 = vector.extract_strided_slice %53 {offsets = [2, 0], sizes = [16, 32], strides = [1, 1]} : vector<22x32xf32> to vector<16x32xf32>
    %71 = vector.shape_cast %69 : vector<32xf32> to vector<1x32xf32>
    %72 = vector.broadcast %71 : vector<1x32xf32> to vector<16x32xf32>
    %73 = arith.mulf %72, %70 : vector<16x32xf32>
    %74 = arith.addf %67, %73 : vector<16x32xf32>
    %c21 = arith.constant 21 : index
    %c0_14 = arith.constant 0 : index
    %75 = vector.load %arg1[%c21, %c0_14] : memref<49x32xf32, #tpu.memory_space<vmem>>, vector<1x32xf32>
    %76 = vector.shape_cast %75 : vector<1x32xf32> to vector<32xf32>
    %77 = vector.extract_strided_slice %53 {offsets = [3, 0], sizes = [16, 32], strides = [1, 1]} : vector<22x32xf32> to vector<16x32xf32>
    %78 = vector.shape_cast %76 : vector<32xf32> to vector<1x32xf32>
    %79 = vector.broadcast %78 : vector<1x32xf32> to vector<16x32xf32>
    %80 = arith.mulf %79, %77 : vector<16x32xf32>
    %81 = arith.addf %74, %80 : vector<16x32xf32>
    %c28 = arith.constant 28 : index
    %c0_15 = arith.constant 0 : index
    %82 = vector.load %arg1[%c28, %c0_15] : memref<49x32xf32, #tpu.memory_space<vmem>>, vector<1x32xf32>
    %83 = vector.shape_cast %82 : vector<1x32xf32> to vector<32xf32>
    %84 = vector.extract_strided_slice %53 {offsets = [4, 0], sizes = [16, 32], strides = [1, 1]} : vector<22x32xf32> to vector<16x32xf32>
    %85 = vector.shape_cast %83 : vector<32xf32> to vector<1x32xf32>
    %86 = vector.broadcast %85 : vector<1x32xf32> to vector<16x32xf32>
    %87 = arith.mulf %86, %84 : vector<16x32xf32>
    %88 = arith.addf %81, %87 : vector<16x32xf32>
    %c35 = arith.constant 35 : index
    %c0_16 = arith.constant 0 : index
    %89 = vector.load %arg1[%c35, %c0_16] : memref<49x32xf32, #tpu.memory_space<vmem>>, vector<1x32xf32>
    %90 = vector.shape_cast %89 : vector<1x32xf32> to vector<32xf32>
    %91 = vector.extract_strided_slice %53 {offsets = [5, 0], sizes = [16, 32], strides = [1, 1]} : vector<22x32xf32> to vector<16x32xf32>
    %92 = vector.shape_cast %90 : vector<32xf32> to vector<1x32xf32>
    %93 = vector.broadcast %92 : vector<1x32xf32> to vector<16x32xf32>
    %94 = arith.mulf %93, %91 : vector<16x32xf32>
    %95 = arith.addf %88, %94 : vector<16x32xf32>
    %c42 = arith.constant 42 : index
    %c0_17 = arith.constant 0 : index
    %96 = vector.load %arg1[%c42, %c0_17] : memref<49x32xf32, #tpu.memory_space<vmem>>, vector<1x32xf32>
    %97 = vector.shape_cast %96 : vector<1x32xf32> to vector<32xf32>
    %98 = vector.extract_strided_slice %53 {offsets = [6, 0], sizes = [16, 32], strides = [1, 1]} : vector<22x32xf32> to vector<16x32xf32>
    %99 = vector.shape_cast %97 : vector<32xf32> to vector<1x32xf32>
    %100 = vector.broadcast %99 : vector<1x32xf32> to vector<16x32xf32>
    %101 = arith.mulf %100, %98 : vector<16x32xf32>
    %102 = arith.addf %95, %101 : vector<16x32xf32>
    %103 = vector.extract_strided_slice %47 {offsets = [0, 1], sizes = [22, 16], strides = [1, 1]} : vector<22x22xf32> to vector<22x16xf32>
    %104 = vector.extract_strided_slice %49 {offsets = [0, 1], sizes = [22, 16], strides = [1, 1]} : vector<22x22xf32> to vector<22x16xf32>
    %105 = tpu.concatenate %103, %104 in 1 : vector<22x16xf32>, vector<22x16xf32> -> vector<22x32xf32>
    %c1 = arith.constant 1 : index
    %c0_18 = arith.constant 0 : index
    %106 = vector.load %arg1[%c1, %c0_18] : memref<49x32xf32, #tpu.memory_space<vmem>>, vector<1x32xf32>
    %107 = vector.shape_cast %106 : vector<1x32xf32> to vector<32xf32>
    %108 = vector.extract_strided_slice %105 {offsets = [0, 0], sizes = [16, 32], strides = [1, 1]} : vector<22x32xf32> to vector<16x32xf32>
    %109 = vector.shape_cast %107 : vector<32xf32> to vector<1x32xf32>
    %110 = vector.broadcast %109 : vector<1x32xf32> to vector<16x32xf32>
    %111 = arith.mulf %110, %108 : vector<16x32xf32>
    %112 = arith.addf %102, %111 : vector<16x32xf32>
    %c8 = arith.constant 8 : index
    %c0_19 = arith.constant 0 : index
    %113 = vector.load %arg1[%c8, %c0_19] : memref<49x32xf32, #tpu.memory_space<vmem>>, vector<1x32xf32>
    %114 = vector.shape_cast %113 : vector<1x32xf32> to vector<32xf32>
    %115 = vector.extract_strided_slice %105 {offsets = [1, 0], sizes = [16, 32], strides = [1, 1]} : vector<22x32xf32> to vector<16x32xf32>
    %116 = vector.shape_cast %114 : vector<32xf32> to vector<1x32xf32>
    %117 = vector.broadcast %116 : vector<1x32xf32> to vector<16x32xf32>
    %118 = arith.mulf %117, %115 : vector<16x32xf32>
    %119 = arith.addf %112, %118 : vector<16x32xf32>
    %c15 = arith.constant 15 : index
    %c0_20 = arith.constant 0 : index
    %120 = vector.load %arg1[%c15, %c0_20] : memref<49x32xf32, #tpu.memory_space<vmem>>, vector<1x32xf32>
    %121 = vector.shape_cast %120 : vector<1x32xf32> to vector<32xf32>
    %122 = vector.extract_strided_slice %105 {offsets = [2, 0], sizes = [16, 32], strides = [1, 1]} : vector<22x32xf32> to vector<16x32xf32>
    %123 = vector.shape_cast %121 : vector<32xf32> to vector<1x32xf32>
    %124 = vector.broadcast %123 : vector<1x32xf32> to vector<16x32xf32>
    %125 = arith.mulf %124, %122 : vector<16x32xf32>
    %126 = arith.addf %119, %125 : vector<16x32xf32>
    %c22 = arith.constant 22 : index
    %c0_21 = arith.constant 0 : index
    %127 = vector.load %arg1[%c22, %c0_21] : memref<49x32xf32, #tpu.memory_space<vmem>>, vector<1x32xf32>
    %128 = vector.shape_cast %127 : vector<1x32xf32> to vector<32xf32>
    %129 = vector.extract_strided_slice %105 {offsets = [3, 0], sizes = [16, 32], strides = [1, 1]} : vector<22x32xf32> to vector<16x32xf32>
    %130 = vector.shape_cast %128 : vector<32xf32> to vector<1x32xf32>
    %131 = vector.broadcast %130 : vector<1x32xf32> to vector<16x32xf32>
    %132 = arith.mulf %131, %129 : vector<16x32xf32>
    %133 = arith.addf %126, %132 : vector<16x32xf32>
    %c29 = arith.constant 29 : index
    %c0_22 = arith.constant 0 : index
    %134 = vector.load %arg1[%c29, %c0_22] : memref<49x32xf32, #tpu.memory_space<vmem>>, vector<1x32xf32>
    %135 = vector.shape_cast %134 : vector<1x32xf32> to vector<32xf32>
    %136 = vector.extract_strided_slice %105 {offsets = [4, 0], sizes = [16, 32], strides = [1, 1]} : vector<22x32xf32> to vector<16x32xf32>
    %137 = vector.shape_cast %135 : vector<32xf32> to vector<1x32xf32>
    %138 = vector.broadcast %137 : vector<1x32xf32> to vector<16x32xf32>
    %139 = arith.mulf %138, %136 : vector<16x32xf32>
    %140 = arith.addf %133, %139 : vector<16x32xf32>
    %c36 = arith.constant 36 : index
    %c0_23 = arith.constant 0 : index
    %141 = vector.load %arg1[%c36, %c0_23] : memref<49x32xf32, #tpu.memory_space<vmem>>, vector<1x32xf32>
    %142 = vector.shape_cast %141 : vector<1x32xf32> to vector<32xf32>
    %143 = vector.extract_strided_slice %105 {offsets = [5, 0], sizes = [16, 32], strides = [1, 1]} : vector<22x32xf32> to vector<16x32xf32>
    %144 = vector.shape_cast %142 : vector<32xf32> to vector<1x32xf32>
    %145 = vector.broadcast %144 : vector<1x32xf32> to vector<16x32xf32>
    %146 = arith.mulf %145, %143 : vector<16x32xf32>
    %147 = arith.addf %140, %146 : vector<16x32xf32>
    %c43 = arith.constant 43 : index
    %c0_24 = arith.constant 0 : index
    %148 = vector.load %arg1[%c43, %c0_24] : memref<49x32xf32, #tpu.memory_space<vmem>>, vector<1x32xf32>
    %149 = vector.shape_cast %148 : vector<1x32xf32> to vector<32xf32>
    %150 = vector.extract_strided_slice %105 {offsets = [6, 0], sizes = [16, 32], strides = [1, 1]} : vector<22x32xf32> to vector<16x32xf32>
    %151 = vector.shape_cast %149 : vector<32xf32> to vector<1x32xf32>
    %152 = vector.broadcast %151 : vector<1x32xf32> to vector<16x32xf32>
    %153 = arith.mulf %152, %150 : vector<16x32xf32>
    %154 = arith.addf %147, %153 : vector<16x32xf32>
    %155 = vector.extract_strided_slice %47 {offsets = [0, 2], sizes = [22, 16], strides = [1, 1]} : vector<22x22xf32> to vector<22x16xf32>
    %156 = vector.extract_strided_slice %49 {offsets = [0, 2], sizes = [22, 16], strides = [1, 1]} : vector<22x22xf32> to vector<22x16xf32>
    %157 = tpu.concatenate %155, %156 in 1 : vector<22x16xf32>, vector<22x16xf32> -> vector<22x32xf32>
    %c2 = arith.constant 2 : index
    %c0_25 = arith.constant 0 : index
    %158 = vector.load %arg1[%c2, %c0_25] : memref<49x32xf32, #tpu.memory_space<vmem>>, vector<1x32xf32>
    %159 = vector.shape_cast %158 : vector<1x32xf32> to vector<32xf32>
    %160 = vector.extract_strided_slice %157 {offsets = [0, 0], sizes = [16, 32], strides = [1, 1]} : vector<22x32xf32> to vector<16x32xf32>
    %161 = vector.shape_cast %159 : vector<32xf32> to vector<1x32xf32>
    %162 = vector.broadcast %161 : vector<1x32xf32> to vector<16x32xf32>
    %163 = arith.mulf %162, %160 : vector<16x32xf32>
    %164 = arith.addf %154, %163 : vector<16x32xf32>
    %c9 = arith.constant 9 : index
    %c0_26 = arith.constant 0 : index
    %165 = vector.load %arg1[%c9, %c0_26] : memref<49x32xf32, #tpu.memory_space<vmem>>, vector<1x32xf32>
    %166 = vector.shape_cast %165 : vector<1x32xf32> to vector<32xf32>
    %167 = vector.extract_strided_slice %157 {offsets = [1, 0], sizes = [16, 32], strides = [1, 1]} : vector<22x32xf32> to vector<16x32xf32>
    %168 = vector.shape_cast %166 : vector<32xf32> to vector<1x32xf32>
    %169 = vector.broadcast %168 : vector<1x32xf32> to vector<16x32xf32>
    %170 = arith.mulf %169, %167 : vector<16x32xf32>
    %171 = arith.addf %164, %170 : vector<16x32xf32>
    %c16 = arith.constant 16 : index
    %c0_27 = arith.constant 0 : index
    %172 = vector.load %arg1[%c16, %c0_27] : memref<49x32xf32, #tpu.memory_space<vmem>>, vector<1x32xf32>
    %173 = vector.shape_cast %172 : vector<1x32xf32> to vector<32xf32>
    %174 = vector.extract_strided_slice %157 {offsets = [2, 0], sizes = [16, 32], strides = [1, 1]} : vector<22x32xf32> to vector<16x32xf32>
    %175 = vector.shape_cast %173 : vector<32xf32> to vector<1x32xf32>
    %176 = vector.broadcast %175 : vector<1x32xf32> to vector<16x32xf32>
    %177 = arith.mulf %176, %174 : vector<16x32xf32>
    %178 = arith.addf %171, %177 : vector<16x32xf32>
    %c23 = arith.constant 23 : index
    %c0_28 = arith.constant 0 : index
    %179 = vector.load %arg1[%c23, %c0_28] : memref<49x32xf32, #tpu.memory_space<vmem>>, vector<1x32xf32>
    %180 = vector.shape_cast %179 : vector<1x32xf32> to vector<32xf32>
    %181 = vector.extract_strided_slice %157 {offsets = [3, 0], sizes = [16, 32], strides = [1, 1]} : vector<22x32xf32> to vector<16x32xf32>
    %182 = vector.shape_cast %180 : vector<32xf32> to vector<1x32xf32>
    %183 = vector.broadcast %182 : vector<1x32xf32> to vector<16x32xf32>
    %184 = arith.mulf %183, %181 : vector<16x32xf32>
    %185 = arith.addf %178, %184 : vector<16x32xf32>
    %c30 = arith.constant 30 : index
    %c0_29 = arith.constant 0 : index
    %186 = vector.load %arg1[%c30, %c0_29] : memref<49x32xf32, #tpu.memory_space<vmem>>, vector<1x32xf32>
    %187 = vector.shape_cast %186 : vector<1x32xf32> to vector<32xf32>
    %188 = vector.extract_strided_slice %157 {offsets = [4, 0], sizes = [16, 32], strides = [1, 1]} : vector<22x32xf32> to vector<16x32xf32>
    %189 = vector.shape_cast %187 : vector<32xf32> to vector<1x32xf32>
    %190 = vector.broadcast %189 : vector<1x32xf32> to vector<16x32xf32>
    %191 = arith.mulf %190, %188 : vector<16x32xf32>
    %192 = arith.addf %185, %191 : vector<16x32xf32>
    %c37 = arith.constant 37 : index
    %c0_30 = arith.constant 0 : index
    %193 = vector.load %arg1[%c37, %c0_30] : memref<49x32xf32, #tpu.memory_space<vmem>>, vector<1x32xf32>
    %194 = vector.shape_cast %193 : vector<1x32xf32> to vector<32xf32>
    %195 = vector.extract_strided_slice %157 {offsets = [5, 0], sizes = [16, 32], strides = [1, 1]} : vector<22x32xf32> to vector<16x32xf32>
    %196 = vector.shape_cast %194 : vector<32xf32> to vector<1x32xf32>
    %197 = vector.broadcast %196 : vector<1x32xf32> to vector<16x32xf32>
    %198 = arith.mulf %197, %195 : vector<16x32xf32>
    %199 = arith.addf %192, %198 : vector<16x32xf32>
    %c44 = arith.constant 44 : index
    %c0_31 = arith.constant 0 : index
    %200 = vector.load %arg1[%c44, %c0_31] : memref<49x32xf32, #tpu.memory_space<vmem>>, vector<1x32xf32>
    %201 = vector.shape_cast %200 : vector<1x32xf32> to vector<32xf32>
    %202 = vector.extract_strided_slice %157 {offsets = [6, 0], sizes = [16, 32], strides = [1, 1]} : vector<22x32xf32> to vector<16x32xf32>
    %203 = vector.shape_cast %201 : vector<32xf32> to vector<1x32xf32>
    %204 = vector.broadcast %203 : vector<1x32xf32> to vector<16x32xf32>
    %205 = arith.mulf %204, %202 : vector<16x32xf32>
    %206 = arith.addf %199, %205 : vector<16x32xf32>
    %207 = vector.extract_strided_slice %47 {offsets = [0, 3], sizes = [22, 16], strides = [1, 1]} : vector<22x22xf32> to vector<22x16xf32>
    %208 = vector.extract_strided_slice %49 {offsets = [0, 3], sizes = [22, 16], strides = [1, 1]} : vector<22x22xf32> to vector<22x16xf32>
    %209 = tpu.concatenate %207, %208 in 1 : vector<22x16xf32>, vector<22x16xf32> -> vector<22x32xf32>
    %c3 = arith.constant 3 : index
    %c0_32 = arith.constant 0 : index
    %210 = vector.load %arg1[%c3, %c0_32] : memref<49x32xf32, #tpu.memory_space<vmem>>, vector<1x32xf32>
    %211 = vector.shape_cast %210 : vector<1x32xf32> to vector<32xf32>
    %212 = vector.extract_strided_slice %209 {offsets = [0, 0], sizes = [16, 32], strides = [1, 1]} : vector<22x32xf32> to vector<16x32xf32>
    %213 = vector.shape_cast %211 : vector<32xf32> to vector<1x32xf32>
    %214 = vector.broadcast %213 : vector<1x32xf32> to vector<16x32xf32>
    %215 = arith.mulf %214, %212 : vector<16x32xf32>
    %216 = arith.addf %206, %215 : vector<16x32xf32>
    %c10 = arith.constant 10 : index
    %c0_33 = arith.constant 0 : index
    %217 = vector.load %arg1[%c10, %c0_33] : memref<49x32xf32, #tpu.memory_space<vmem>>, vector<1x32xf32>
    %218 = vector.shape_cast %217 : vector<1x32xf32> to vector<32xf32>
    %219 = vector.extract_strided_slice %209 {offsets = [1, 0], sizes = [16, 32], strides = [1, 1]} : vector<22x32xf32> to vector<16x32xf32>
    %220 = vector.shape_cast %218 : vector<32xf32> to vector<1x32xf32>
    %221 = vector.broadcast %220 : vector<1x32xf32> to vector<16x32xf32>
    %222 = arith.mulf %221, %219 : vector<16x32xf32>
    %223 = arith.addf %216, %222 : vector<16x32xf32>
    %c17 = arith.constant 17 : index
    %c0_34 = arith.constant 0 : index
    %224 = vector.load %arg1[%c17, %c0_34] : memref<49x32xf32, #tpu.memory_space<vmem>>, vector<1x32xf32>
    %225 = vector.shape_cast %224 : vector<1x32xf32> to vector<32xf32>
    %226 = vector.extract_strided_slice %209 {offsets = [2, 0], sizes = [16, 32], strides = [1, 1]} : vector<22x32xf32> to vector<16x32xf32>
    %227 = vector.shape_cast %225 : vector<32xf32> to vector<1x32xf32>
    %228 = vector.broadcast %227 : vector<1x32xf32> to vector<16x32xf32>
    %229 = arith.mulf %228, %226 : vector<16x32xf32>
    %230 = arith.addf %223, %229 : vector<16x32xf32>
    %c24 = arith.constant 24 : index
    %c0_35 = arith.constant 0 : index
    %231 = vector.load %arg1[%c24, %c0_35] : memref<49x32xf32, #tpu.memory_space<vmem>>, vector<1x32xf32>
    %232 = vector.shape_cast %231 : vector<1x32xf32> to vector<32xf32>
    %233 = vector.extract_strided_slice %209 {offsets = [3, 0], sizes = [16, 32], strides = [1, 1]} : vector<22x32xf32> to vector<16x32xf32>
    %234 = vector.shape_cast %232 : vector<32xf32> to vector<1x32xf32>
    %235 = vector.broadcast %234 : vector<1x32xf32> to vector<16x32xf32>
    %236 = arith.mulf %235, %233 : vector<16x32xf32>
    %237 = arith.addf %230, %236 : vector<16x32xf32>
    %c31 = arith.constant 31 : index
    %c0_36 = arith.constant 0 : index
    %238 = vector.load %arg1[%c31, %c0_36] : memref<49x32xf32, #tpu.memory_space<vmem>>, vector<1x32xf32>
    %239 = vector.shape_cast %238 : vector<1x32xf32> to vector<32xf32>
    %240 = vector.extract_strided_slice %209 {offsets = [4, 0], sizes = [16, 32], strides = [1, 1]} : vector<22x32xf32> to vector<16x32xf32>
    %241 = vector.shape_cast %239 : vector<32xf32> to vector<1x32xf32>
    %242 = vector.broadcast %241 : vector<1x32xf32> to vector<16x32xf32>
    %243 = arith.mulf %242, %240 : vector<16x32xf32>
    %244 = arith.addf %237, %243 : vector<16x32xf32>
    %c38 = arith.constant 38 : index
    %c0_37 = arith.constant 0 : index
    %245 = vector.load %arg1[%c38, %c0_37] : memref<49x32xf32, #tpu.memory_space<vmem>>, vector<1x32xf32>
    %246 = vector.shape_cast %245 : vector<1x32xf32> to vector<32xf32>
    %247 = vector.extract_strided_slice %209 {offsets = [5, 0], sizes = [16, 32], strides = [1, 1]} : vector<22x32xf32> to vector<16x32xf32>
    %248 = vector.shape_cast %246 : vector<32xf32> to vector<1x32xf32>
    %249 = vector.broadcast %248 : vector<1x32xf32> to vector<16x32xf32>
    %250 = arith.mulf %249, %247 : vector<16x32xf32>
    %251 = arith.addf %244, %250 : vector<16x32xf32>
    %c45 = arith.constant 45 : index
    %c0_38 = arith.constant 0 : index
    %252 = vector.load %arg1[%c45, %c0_38] : memref<49x32xf32, #tpu.memory_space<vmem>>, vector<1x32xf32>
    %253 = vector.shape_cast %252 : vector<1x32xf32> to vector<32xf32>
    %254 = vector.extract_strided_slice %209 {offsets = [6, 0], sizes = [16, 32], strides = [1, 1]} : vector<22x32xf32> to vector<16x32xf32>
    %255 = vector.shape_cast %253 : vector<32xf32> to vector<1x32xf32>
    %256 = vector.broadcast %255 : vector<1x32xf32> to vector<16x32xf32>
    %257 = arith.mulf %256, %254 : vector<16x32xf32>
    %258 = arith.addf %251, %257 : vector<16x32xf32>
    %259 = vector.extract_strided_slice %47 {offsets = [0, 4], sizes = [22, 16], strides = [1, 1]} : vector<22x22xf32> to vector<22x16xf32>
    %260 = vector.extract_strided_slice %49 {offsets = [0, 4], sizes = [22, 16], strides = [1, 1]} : vector<22x22xf32> to vector<22x16xf32>
    %261 = tpu.concatenate %259, %260 in 1 : vector<22x16xf32>, vector<22x16xf32> -> vector<22x32xf32>
    %c4 = arith.constant 4 : index
    %c0_39 = arith.constant 0 : index
    %262 = vector.load %arg1[%c4, %c0_39] : memref<49x32xf32, #tpu.memory_space<vmem>>, vector<1x32xf32>
    %263 = vector.shape_cast %262 : vector<1x32xf32> to vector<32xf32>
    %264 = vector.extract_strided_slice %261 {offsets = [0, 0], sizes = [16, 32], strides = [1, 1]} : vector<22x32xf32> to vector<16x32xf32>
    %265 = vector.shape_cast %263 : vector<32xf32> to vector<1x32xf32>
    %266 = vector.broadcast %265 : vector<1x32xf32> to vector<16x32xf32>
    %267 = arith.mulf %266, %264 : vector<16x32xf32>
    %268 = arith.addf %258, %267 : vector<16x32xf32>
    %c11 = arith.constant 11 : index
    %c0_40 = arith.constant 0 : index
    %269 = vector.load %arg1[%c11, %c0_40] : memref<49x32xf32, #tpu.memory_space<vmem>>, vector<1x32xf32>
    %270 = vector.shape_cast %269 : vector<1x32xf32> to vector<32xf32>
    %271 = vector.extract_strided_slice %261 {offsets = [1, 0], sizes = [16, 32], strides = [1, 1]} : vector<22x32xf32> to vector<16x32xf32>
    %272 = vector.shape_cast %270 : vector<32xf32> to vector<1x32xf32>
    %273 = vector.broadcast %272 : vector<1x32xf32> to vector<16x32xf32>
    %274 = arith.mulf %273, %271 : vector<16x32xf32>
    %275 = arith.addf %268, %274 : vector<16x32xf32>
    %c18 = arith.constant 18 : index
    %c0_41 = arith.constant 0 : index
    %276 = vector.load %arg1[%c18, %c0_41] : memref<49x32xf32, #tpu.memory_space<vmem>>, vector<1x32xf32>
    %277 = vector.shape_cast %276 : vector<1x32xf32> to vector<32xf32>
    %278 = vector.extract_strided_slice %261 {offsets = [2, 0], sizes = [16, 32], strides = [1, 1]} : vector<22x32xf32> to vector<16x32xf32>
    %279 = vector.shape_cast %277 : vector<32xf32> to vector<1x32xf32>
    %280 = vector.broadcast %279 : vector<1x32xf32> to vector<16x32xf32>
    %281 = arith.mulf %280, %278 : vector<16x32xf32>
    %282 = arith.addf %275, %281 : vector<16x32xf32>
    %c25 = arith.constant 25 : index
    %c0_42 = arith.constant 0 : index
    %283 = vector.load %arg1[%c25, %c0_42] : memref<49x32xf32, #tpu.memory_space<vmem>>, vector<1x32xf32>
    %284 = vector.shape_cast %283 : vector<1x32xf32> to vector<32xf32>
    %285 = vector.extract_strided_slice %261 {offsets = [3, 0], sizes = [16, 32], strides = [1, 1]} : vector<22x32xf32> to vector<16x32xf32>
    %286 = vector.shape_cast %284 : vector<32xf32> to vector<1x32xf32>
    %287 = vector.broadcast %286 : vector<1x32xf32> to vector<16x32xf32>
    %288 = arith.mulf %287, %285 : vector<16x32xf32>
    %289 = arith.addf %282, %288 : vector<16x32xf32>
    %c32 = arith.constant 32 : index
    %c0_43 = arith.constant 0 : index
    %290 = vector.load %arg1[%c32, %c0_43] : memref<49x32xf32, #tpu.memory_space<vmem>>, vector<1x32xf32>
    %291 = vector.shape_cast %290 : vector<1x32xf32> to vector<32xf32>
    %292 = vector.extract_strided_slice %261 {offsets = [4, 0], sizes = [16, 32], strides = [1, 1]} : vector<22x32xf32> to vector<16x32xf32>
    %293 = vector.shape_cast %291 : vector<32xf32> to vector<1x32xf32>
    %294 = vector.broadcast %293 : vector<1x32xf32> to vector<16x32xf32>
    %295 = arith.mulf %294, %292 : vector<16x32xf32>
    %296 = arith.addf %289, %295 : vector<16x32xf32>
    %c39 = arith.constant 39 : index
    %c0_44 = arith.constant 0 : index
    %297 = vector.load %arg1[%c39, %c0_44] : memref<49x32xf32, #tpu.memory_space<vmem>>, vector<1x32xf32>
    %298 = vector.shape_cast %297 : vector<1x32xf32> to vector<32xf32>
    %299 = vector.extract_strided_slice %261 {offsets = [5, 0], sizes = [16, 32], strides = [1, 1]} : vector<22x32xf32> to vector<16x32xf32>
    %300 = vector.shape_cast %298 : vector<32xf32> to vector<1x32xf32>
    %301 = vector.broadcast %300 : vector<1x32xf32> to vector<16x32xf32>
    %302 = arith.mulf %301, %299 : vector<16x32xf32>
    %303 = arith.addf %296, %302 : vector<16x32xf32>
    %c46 = arith.constant 46 : index
    %c0_45 = arith.constant 0 : index
    %304 = vector.load %arg1[%c46, %c0_45] : memref<49x32xf32, #tpu.memory_space<vmem>>, vector<1x32xf32>
    %305 = vector.shape_cast %304 : vector<1x32xf32> to vector<32xf32>
    %306 = vector.extract_strided_slice %261 {offsets = [6, 0], sizes = [16, 32], strides = [1, 1]} : vector<22x32xf32> to vector<16x32xf32>
    %307 = vector.shape_cast %305 : vector<32xf32> to vector<1x32xf32>
    %308 = vector.broadcast %307 : vector<1x32xf32> to vector<16x32xf32>
    %309 = arith.mulf %308, %306 : vector<16x32xf32>
    %310 = arith.addf %303, %309 : vector<16x32xf32>
    %311 = vector.extract_strided_slice %47 {offsets = [0, 5], sizes = [22, 16], strides = [1, 1]} : vector<22x22xf32> to vector<22x16xf32>
    %312 = vector.extract_strided_slice %49 {offsets = [0, 5], sizes = [22, 16], strides = [1, 1]} : vector<22x22xf32> to vector<22x16xf32>
    %313 = tpu.concatenate %311, %312 in 1 : vector<22x16xf32>, vector<22x16xf32> -> vector<22x32xf32>
    %c5 = arith.constant 5 : index
    %c0_46 = arith.constant 0 : index
    %314 = vector.load %arg1[%c5, %c0_46] : memref<49x32xf32, #tpu.memory_space<vmem>>, vector<1x32xf32>
    %315 = vector.shape_cast %314 : vector<1x32xf32> to vector<32xf32>
    %316 = vector.extract_strided_slice %313 {offsets = [0, 0], sizes = [16, 32], strides = [1, 1]} : vector<22x32xf32> to vector<16x32xf32>
    %317 = vector.shape_cast %315 : vector<32xf32> to vector<1x32xf32>
    %318 = vector.broadcast %317 : vector<1x32xf32> to vector<16x32xf32>
    %319 = arith.mulf %318, %316 : vector<16x32xf32>
    %320 = arith.addf %310, %319 : vector<16x32xf32>
    %c12 = arith.constant 12 : index
    %c0_47 = arith.constant 0 : index
    %321 = vector.load %arg1[%c12, %c0_47] : memref<49x32xf32, #tpu.memory_space<vmem>>, vector<1x32xf32>
    %322 = vector.shape_cast %321 : vector<1x32xf32> to vector<32xf32>
    %323 = vector.extract_strided_slice %313 {offsets = [1, 0], sizes = [16, 32], strides = [1, 1]} : vector<22x32xf32> to vector<16x32xf32>
    %324 = vector.shape_cast %322 : vector<32xf32> to vector<1x32xf32>
    %325 = vector.broadcast %324 : vector<1x32xf32> to vector<16x32xf32>
    %326 = arith.mulf %325, %323 : vector<16x32xf32>
    %327 = arith.addf %320, %326 : vector<16x32xf32>
    %c19 = arith.constant 19 : index
    %c0_48 = arith.constant 0 : index
    %328 = vector.load %arg1[%c19, %c0_48] : memref<49x32xf32, #tpu.memory_space<vmem>>, vector<1x32xf32>
    %329 = vector.shape_cast %328 : vector<1x32xf32> to vector<32xf32>
    %330 = vector.extract_strided_slice %313 {offsets = [2, 0], sizes = [16, 32], strides = [1, 1]} : vector<22x32xf32> to vector<16x32xf32>
    %331 = vector.shape_cast %329 : vector<32xf32> to vector<1x32xf32>
    %332 = vector.broadcast %331 : vector<1x32xf32> to vector<16x32xf32>
    %333 = arith.mulf %332, %330 : vector<16x32xf32>
    %334 = arith.addf %327, %333 : vector<16x32xf32>
    %c26 = arith.constant 26 : index
    %c0_49 = arith.constant 0 : index
    %335 = vector.load %arg1[%c26, %c0_49] : memref<49x32xf32, #tpu.memory_space<vmem>>, vector<1x32xf32>
    %336 = vector.shape_cast %335 : vector<1x32xf32> to vector<32xf32>
    %337 = vector.extract_strided_slice %313 {offsets = [3, 0], sizes = [16, 32], strides = [1, 1]} : vector<22x32xf32> to vector<16x32xf32>
    %338 = vector.shape_cast %336 : vector<32xf32> to vector<1x32xf32>
    %339 = vector.broadcast %338 : vector<1x32xf32> to vector<16x32xf32>
    %340 = arith.mulf %339, %337 : vector<16x32xf32>
    %341 = arith.addf %334, %340 : vector<16x32xf32>
    %c33 = arith.constant 33 : index
    %c0_50 = arith.constant 0 : index
    %342 = vector.load %arg1[%c33, %c0_50] : memref<49x32xf32, #tpu.memory_space<vmem>>, vector<1x32xf32>
    %343 = vector.shape_cast %342 : vector<1x32xf32> to vector<32xf32>
    %344 = vector.extract_strided_slice %313 {offsets = [4, 0], sizes = [16, 32], strides = [1, 1]} : vector<22x32xf32> to vector<16x32xf32>
    %345 = vector.shape_cast %343 : vector<32xf32> to vector<1x32xf32>
    %346 = vector.broadcast %345 : vector<1x32xf32> to vector<16x32xf32>
    %347 = arith.mulf %346, %344 : vector<16x32xf32>
    %348 = arith.addf %341, %347 : vector<16x32xf32>
    %c40 = arith.constant 40 : index
    %c0_51 = arith.constant 0 : index
    %349 = vector.load %arg1[%c40, %c0_51] : memref<49x32xf32, #tpu.memory_space<vmem>>, vector<1x32xf32>
    %350 = vector.shape_cast %349 : vector<1x32xf32> to vector<32xf32>
    %351 = vector.extract_strided_slice %313 {offsets = [5, 0], sizes = [16, 32], strides = [1, 1]} : vector<22x32xf32> to vector<16x32xf32>
    %352 = vector.shape_cast %350 : vector<32xf32> to vector<1x32xf32>
    %353 = vector.broadcast %352 : vector<1x32xf32> to vector<16x32xf32>
    %354 = arith.mulf %353, %351 : vector<16x32xf32>
    %355 = arith.addf %348, %354 : vector<16x32xf32>
    %c47 = arith.constant 47 : index
    %c0_52 = arith.constant 0 : index
    %356 = vector.load %arg1[%c47, %c0_52] : memref<49x32xf32, #tpu.memory_space<vmem>>, vector<1x32xf32>
    %357 = vector.shape_cast %356 : vector<1x32xf32> to vector<32xf32>
    %358 = vector.extract_strided_slice %313 {offsets = [6, 0], sizes = [16, 32], strides = [1, 1]} : vector<22x32xf32> to vector<16x32xf32>
    %359 = vector.shape_cast %357 : vector<32xf32> to vector<1x32xf32>
    %360 = vector.broadcast %359 : vector<1x32xf32> to vector<16x32xf32>
    %361 = arith.mulf %360, %358 : vector<16x32xf32>
    %362 = arith.addf %355, %361 : vector<16x32xf32>
    %363 = vector.extract_strided_slice %47 {offsets = [0, 6], sizes = [22, 16], strides = [1, 1]} : vector<22x22xf32> to vector<22x16xf32>
    %364 = vector.extract_strided_slice %49 {offsets = [0, 6], sizes = [22, 16], strides = [1, 1]} : vector<22x22xf32> to vector<22x16xf32>
    %365 = tpu.concatenate %363, %364 in 1 : vector<22x16xf32>, vector<22x16xf32> -> vector<22x32xf32>
    %c6 = arith.constant 6 : index
    %c0_53 = arith.constant 0 : index
    %366 = vector.load %arg1[%c6, %c0_53] : memref<49x32xf32, #tpu.memory_space<vmem>>, vector<1x32xf32>
    %367 = vector.shape_cast %366 : vector<1x32xf32> to vector<32xf32>
    %368 = vector.extract_strided_slice %365 {offsets = [0, 0], sizes = [16, 32], strides = [1, 1]} : vector<22x32xf32> to vector<16x32xf32>
    %369 = vector.shape_cast %367 : vector<32xf32> to vector<1x32xf32>
    %370 = vector.broadcast %369 : vector<1x32xf32> to vector<16x32xf32>
    %371 = arith.mulf %370, %368 : vector<16x32xf32>
    %372 = arith.addf %362, %371 : vector<16x32xf32>
    %c13 = arith.constant 13 : index
    %c0_54 = arith.constant 0 : index
    %373 = vector.load %arg1[%c13, %c0_54] : memref<49x32xf32, #tpu.memory_space<vmem>>, vector<1x32xf32>
    %374 = vector.shape_cast %373 : vector<1x32xf32> to vector<32xf32>
    %375 = vector.extract_strided_slice %365 {offsets = [1, 0], sizes = [16, 32], strides = [1, 1]} : vector<22x32xf32> to vector<16x32xf32>
    %376 = vector.shape_cast %374 : vector<32xf32> to vector<1x32xf32>
    %377 = vector.broadcast %376 : vector<1x32xf32> to vector<16x32xf32>
    %378 = arith.mulf %377, %375 : vector<16x32xf32>
    %379 = arith.addf %372, %378 : vector<16x32xf32>
    %c20 = arith.constant 20 : index
    %c0_55 = arith.constant 0 : index
    %380 = vector.load %arg1[%c20, %c0_55] : memref<49x32xf32, #tpu.memory_space<vmem>>, vector<1x32xf32>
    %381 = vector.shape_cast %380 : vector<1x32xf32> to vector<32xf32>
    %382 = vector.extract_strided_slice %365 {offsets = [2, 0], sizes = [16, 32], strides = [1, 1]} : vector<22x32xf32> to vector<16x32xf32>
    %383 = vector.shape_cast %381 : vector<32xf32> to vector<1x32xf32>
    %384 = vector.broadcast %383 : vector<1x32xf32> to vector<16x32xf32>
    %385 = arith.mulf %384, %382 : vector<16x32xf32>
    %386 = arith.addf %379, %385 : vector<16x32xf32>
    %c27 = arith.constant 27 : index
    %c0_56 = arith.constant 0 : index
    %387 = vector.load %arg1[%c27, %c0_56] : memref<49x32xf32, #tpu.memory_space<vmem>>, vector<1x32xf32>
    %388 = vector.shape_cast %387 : vector<1x32xf32> to vector<32xf32>
    %389 = vector.extract_strided_slice %365 {offsets = [3, 0], sizes = [16, 32], strides = [1, 1]} : vector<22x32xf32> to vector<16x32xf32>
    %390 = vector.shape_cast %388 : vector<32xf32> to vector<1x32xf32>
    %391 = vector.broadcast %390 : vector<1x32xf32> to vector<16x32xf32>
    %392 = arith.mulf %391, %389 : vector<16x32xf32>
    %393 = arith.addf %386, %392 : vector<16x32xf32>
    %c34 = arith.constant 34 : index
    %c0_57 = arith.constant 0 : index
    %394 = vector.load %arg1[%c34, %c0_57] : memref<49x32xf32, #tpu.memory_space<vmem>>, vector<1x32xf32>
    %395 = vector.shape_cast %394 : vector<1x32xf32> to vector<32xf32>
    %396 = vector.extract_strided_slice %365 {offsets = [4, 0], sizes = [16, 32], strides = [1, 1]} : vector<22x32xf32> to vector<16x32xf32>
    %397 = vector.shape_cast %395 : vector<32xf32> to vector<1x32xf32>
    %398 = vector.broadcast %397 : vector<1x32xf32> to vector<16x32xf32>
    %399 = arith.mulf %398, %396 : vector<16x32xf32>
    %400 = arith.addf %393, %399 : vector<16x32xf32>
    %c41 = arith.constant 41 : index
    %c0_58 = arith.constant 0 : index
    %401 = vector.load %arg1[%c41, %c0_58] : memref<49x32xf32, #tpu.memory_space<vmem>>, vector<1x32xf32>
    %402 = vector.shape_cast %401 : vector<1x32xf32> to vector<32xf32>
    %403 = vector.extract_strided_slice %365 {offsets = [5, 0], sizes = [16, 32], strides = [1, 1]} : vector<22x32xf32> to vector<16x32xf32>
    %404 = vector.shape_cast %402 : vector<32xf32> to vector<1x32xf32>
    %405 = vector.broadcast %404 : vector<1x32xf32> to vector<16x32xf32>
    %406 = arith.mulf %405, %403 : vector<16x32xf32>
    %407 = arith.addf %400, %406 : vector<16x32xf32>
    %c48 = arith.constant 48 : index
    %c0_59 = arith.constant 0 : index
    %408 = vector.load %arg1[%c48, %c0_59] : memref<49x32xf32, #tpu.memory_space<vmem>>, vector<1x32xf32>
    %409 = vector.shape_cast %408 : vector<1x32xf32> to vector<32xf32>
    %410 = vector.extract_strided_slice %365 {offsets = [6, 0], sizes = [16, 32], strides = [1, 1]} : vector<22x32xf32> to vector<16x32xf32>
    %411 = vector.shape_cast %409 : vector<32xf32> to vector<1x32xf32>
    %412 = vector.broadcast %411 : vector<1x32xf32> to vector<16x32xf32>
    %413 = arith.mulf %412, %410 : vector<16x32xf32>
    %414 = arith.addf %407, %413 : vector<16x32xf32>
    %415 = vector.extract_strided_slice %414 {offsets = [0, 0], sizes = [16, 16], strides = [1, 1]} : vector<16x32xf32> to vector<16x16xf32>
    %416 = vector.extract_strided_slice %414 {offsets = [0, 16], sizes = [16, 16], strides = [1, 1]} : vector<16x32xf32> to vector<16x16xf32>
    %417 = arith.addf %415, %416 : vector<16x16xf32>
    %c0_60 = arith.constant 0 : index
    %418 = memref.load %arg2[%c0_60] : memref<1xf32, #tpu.memory_space<smem>>
    %419 = vector.broadcast %418 : f32 to vector<16x16xf32>
    %420 = arith.addf %417, %419 : vector<16x16xf32>
    %421 = arith.negf %420 : vector<16x16xf32>
    %422 = math.exp %421 : vector<16x16xf32>
    %cst_61 = arith.constant 1.000000e+00 : f32
    %423 = vector.broadcast %cst_61 : f32 to vector<16x16xf32>
    %424 = arith.addf %423, %422 : vector<16x16xf32>
    %425 = arith.divf %423, %424 : vector<16x16xf32>
    %426 = vector.extract_strided_slice %425 {offsets = [0, 0], sizes = [1, 16], strides = [1, 1]} : vector<16x16xf32> to vector<1x16xf32>
    %427 = vector.extract_strided_slice %425 {offsets = [1, 0], sizes = [1, 16], strides = [1, 1]} : vector<16x16xf32> to vector<1x16xf32>
    %428 = vector.extract_strided_slice %425 {offsets = [2, 0], sizes = [1, 16], strides = [1, 1]} : vector<16x16xf32> to vector<1x16xf32>
    %429 = vector.extract_strided_slice %425 {offsets = [3, 0], sizes = [1, 16], strides = [1, 1]} : vector<16x16xf32> to vector<1x16xf32>
    %430 = vector.extract_strided_slice %425 {offsets = [4, 0], sizes = [1, 16], strides = [1, 1]} : vector<16x16xf32> to vector<1x16xf32>
    %431 = vector.extract_strided_slice %425 {offsets = [5, 0], sizes = [1, 16], strides = [1, 1]} : vector<16x16xf32> to vector<1x16xf32>
    %432 = vector.extract_strided_slice %425 {offsets = [6, 0], sizes = [1, 16], strides = [1, 1]} : vector<16x16xf32> to vector<1x16xf32>
    %433 = vector.extract_strided_slice %425 {offsets = [7, 0], sizes = [1, 16], strides = [1, 1]} : vector<16x16xf32> to vector<1x16xf32>
    %434 = vector.extract_strided_slice %425 {offsets = [8, 0], sizes = [1, 16], strides = [1, 1]} : vector<16x16xf32> to vector<1x16xf32>
    %435 = vector.extract_strided_slice %425 {offsets = [9, 0], sizes = [1, 16], strides = [1, 1]} : vector<16x16xf32> to vector<1x16xf32>
    %436 = vector.extract_strided_slice %425 {offsets = [10, 0], sizes = [1, 16], strides = [1, 1]} : vector<16x16xf32> to vector<1x16xf32>
    %437 = vector.extract_strided_slice %425 {offsets = [11, 0], sizes = [1, 16], strides = [1, 1]} : vector<16x16xf32> to vector<1x16xf32>
    %438 = vector.extract_strided_slice %425 {offsets = [12, 0], sizes = [1, 16], strides = [1, 1]} : vector<16x16xf32> to vector<1x16xf32>
    %439 = vector.extract_strided_slice %425 {offsets = [13, 0], sizes = [1, 16], strides = [1, 1]} : vector<16x16xf32> to vector<1x16xf32>
    %440 = vector.extract_strided_slice %425 {offsets = [14, 0], sizes = [1, 16], strides = [1, 1]} : vector<16x16xf32> to vector<1x16xf32>
    %441 = vector.extract_strided_slice %425 {offsets = [15, 0], sizes = [1, 16], strides = [1, 1]} : vector<16x16xf32> to vector<1x16xf32>
    %442 = tpu.concatenate %426, %427, %428, %429, %430, %431, %432, %433, %434, %435, %436, %437, %438, %439, %440, %441 in 1 : vector<1x16xf32>, vector<1x16xf32>, vector<1x16xf32>, vector<1x16xf32>, vector<1x16xf32>, vector<1x16xf32>, vector<1x16xf32>, vector<1x16xf32>, vector<1x16xf32>, vector<1x16xf32>, vector<1x16xf32>, vector<1x16xf32>, vector<1x16xf32>, vector<1x16xf32>, vector<1x16xf32>, vector<1x16xf32> -> vector<1x256xf32>
    %c0_62 = arith.constant 0 : index
    %c0_63 = arith.constant 0 : index
    %c0_64 = arith.constant 0 : index
    %443 = vector.load %arg3[%c0_62, %c0_63, %c0_64] : memref<1x4x256xf32, #tpu.memory_space<vmem>>, vector<1x4x256xf32>
    %444 = vector.shape_cast %443 : vector<1x4x256xf32> to vector<4x256xf32>
    %445 = vector.broadcast %442 : vector<1x256xf32> to vector<4x256xf32>
    %446 = arith.mulf %444, %445 : vector<4x256xf32>
    %c0_65 = arith.constant 0 : index
    %c0_66 = arith.constant 0 : index
    %c0_67 = arith.constant 0 : index
    %447 = vector.load %arg4[%c0_65, %c0_66, %c0_67] : memref<1x4x256xf32, #tpu.memory_space<vmem>>, vector<1x4x256xf32>
    %448 = vector.shape_cast %447 : vector<1x4x256xf32> to vector<4x256xf32>
    %449 = vector.shape_cast %446 : vector<4x256xf32> to vector<1x4x256xf32>
    tpu.vector_store %arg4[%c0_65, %c0_66, %c0_67], %449 {strides = array<i32>} : memref<1x4x256xf32, #tpu.memory_space<vmem>>, vector<1x4x256xf32>,
    return
  }
  func.func @transform_0(%arg0: i32) -> (i32, i32) {
    %c0_i32 = arith.constant 0 : i32
    %c0_i32_0 = arith.constant 0 : i32
    %c0_i32_1 = arith.constant 0 : i32
    return %c0_i32, %c0_i32_0 : i32, i32
  }
  func.func @transform_1(%arg0: i32) -> i32 {
    %c0_i32 = arith.constant 0 : i32
    %c0_i32_0 = arith.constant 0 : i32
    return %c0_i32 : i32
  }
  func.func @transform_2(%arg0: i32) -> (i32, i32, i32) {
    %c0_i32 = arith.constant 0 : i32
    %c0_i32_0 = arith.constant 0 : i32
    %c0_i32_1 = arith.constant 0 : i32
    return %arg0, %c0_i32, %c0_i32_0 : i32, i32, i32
  }
  func.func @transform_3(%arg0: i32) -> (i32, i32, i32) {
    %c0_i32 = arith.constant 0 : i32
    %c0_i32_0 = arith.constant 0 : i32
    %c0_i32_1 = arith.constant 0 : i32
    return %arg0, %c0_i32, %c0_i32_0 : i32, i32, i32
  }
}

</mosaic_0001>

<bundles_post_ra>
// kernel: tpu_custom_call.1
= control target key start
LH: loop header
LB: loop body
LE: loop exit
PB: predicated region body
PF: predicated region fallthrough
CT: control target
= control target key end

     0   :  { %s2395_s0 = inlined_call_operand.vmem [shape: f32[49,32], index: 0, kind: input, shape index: {}]   ;;  %s2396_s1 = inlined_call_operand.<no memory space> [shape: f32[1], index: 1, kind: input, shape index: {}]   ;;  %s2397_s2 = inlined_call_operand.vmem [shape: f32[2,4,256], index: 2, kind: input, shape index: {}]   ;;  %s2398_s3 = inlined_call_operand.hbm [shape: f32[2,4,256], index: 3, kind: output, shape index: {}]  }
   0x1   :  { %8 = sst [smem:[#allocation2]] %s2396_s1 }
   0x2   :  { %9 = vsyncpa [#allocation4], 0 }
   0x3   :  { %11 = vsyncpa [#allocation4 + $0x1], 0  ;;  %s1851_s14 = smov 0   ;;  %s1853_s15 = smov 0  }
   0x4   :  { %s1855_s16 = smov 0   ;;  %s1857_s17 = smov 0  }
   0x5 LB: > { %s1872_s1 = sadd.s32 4294967295, %s1805_s17   ;;  %s1611_s18 = sadd.s32 4294967294, %s1805_s17   ;;  %s1805_s17 = sphi %s1857_s17, %s2404_s17   ;;  %s1801_s16 = sphi %s1855_s16, %s2403_s16   ;;  %s1797_s15 = sphi %s1853_s15, %s2402_s15   ;;  %s1793_s14 = sphi %s1851_s14, %s2401_s14  }
   0x6   : > { %s1876_s19 = sadd.s32 1, %s1805_s17   ;;  %s92_s20 = sadd.s32 1, %s1801_s16 }
   0x7   : > { %s89_s21 = ssub.s32 %s1805_s17, %s1876_s19  ;;  %p102_p0 = scmp.ne.s32.totalorder %s1801_s16, %s1797_s15 }
   0x8   : > { %p90_p1 = scmp.eq.s32.totalorder %s89_s21, 0  ;;  %p103_p2 = scmp.eq.s32.totalorder %s1872_s1, 1 }
   0x9   : > { %p108_p3 = scmp.ne.s32.totalorder %s1797_s15, %s1793_s14  ;;  %p109_p4 = scmp.eq.s32.totalorder %s1611_s18, 1 }
   0xa   : > { %s1887_s22 = scalar_select %p90_p1, %s1801_s16, %s92_s20  }
   0xb   : > { %p1889_p5 = por %p103_p2, %p102_p0  ;;  %p1893_p6 = por %p109_p4, %p108_p3 }
   0xc   : > { %p1614_p7 = scmp.ge.s32.totalorder %s1805_s17, 1  ;;  %p141_p8 = scmp.lt.s32.totalorder %s1805_s17, 3 }
   0xe   : > { %p142_p9 = pnand %p1614_p7, %p141_p8 }
   0xf   : > { %p165_p10 = scmp.lt.s32.totalorder (!%p142_p9), %s1872_s1, 1  ;;  %s1807_s30 = smov (!%p142_p9), 96  }
  0x10   : > { %145 = sbr.rel (%p142_p9) target bundleno = 863 (0x35f), region = 32  ;;  %s1808_s4 = smov (!%p142_p9), 112  }
  0x11   : > { %s1809_s5 = smov (!%p142_p9), 80   ;;  %s1810_s6 = smov (!%p142_p9), 64  }
  0x12   : > { %s1811_s7 = smov (!%p142_p9), 48   ;;  %s1812_s8 = smov (!%p142_p9), 32  }
  0x13   : > { %s1813_s9 = smov (!%p142_p9), 16   ;;  %s1814_s10 = smov (!%p142_p9), 3  }
  0x14   : > { %s1815_s11 = smov (!%p142_p9), 15   ;;  %s1816_s12 = smov (!%p142_p9), 127  }
  0x15   : > { %s166_s25 = scalar_select %p165_p10, %s1872_s1, 1  ;;  %vm174_vm0 = vcmask 1043456   ;;  %vm250_vm1 = vcmask 1040384   ;;  %vm252_vm2 = vcmask 1041408   ;;  %vm254_vm3 = vcmask 1042432  }
  0x16   : > { %vm257_vm4 = vcmask 1044480   ;;  %vm259_vm5 = vcmask 1045504   ;;  %vm261_vm6 = vcmask 1046528   ;;  %vm336_vm7 = vcmask 23552   ;;  %s1817_s13 = smov 14   ;;  %s1818_s18 = smov 126  }
  0x17   : > { %s1674_s26 = sshll.u32 %s166_s25, 3  ;;  %vm339_vm8 = vcmask 154624   ;;  %s1819_s20 = smov 13   ;;  %vm384_vm9 = vcmask 130048   ;;  %vm1504_vm10 = vcmask 261120   ;;  %vm1506_vm11 = vcmask 392192  }
  0x18   : > { %s1904_s29 = scalar_lea.vmem %s2397_s2, %s1674_s26  ;;  %s1820_s21 = smov 125   ;;  %vm1508_vm12 = vcmask 523264   ;;  %vm1510_vm13 = vcmask 654336   ;;  %vm1512_vm14 = vcmask 785408   ;;  %vm1514_vm15 = vcmask 916480  }
  0x19   : > { %v170_v0 = vld [vmem:[%s1904_s29] sm:$0xff]  ;;  %s1821_s25 = smov 12   ;;  %s1822_s26 = smov 124  }
  0x1a   : > { %v192_v1 = vsel %vm174_vm0, %v170_v0, -inf  ;;  %v172_v2 = vcombine.high %v170_v0, %v170_v0  ;;  %v175_v13 = vsel %vm174_vm0, %v170_v0, 0.0  ;;  %s1823_s27 = smov 11   ;;  %s1824_s28 = smov 123  }
  0x1b   : > { %v193_v3 = vrot.slane %v192_v1, 4  ;;  %v176_v18 = vrot.slane %v175_v13, 4 }
  0x1c   : > { %v199_v4 = vsel %vm174_vm0, %v172_v2, -inf  ;;  %v182_v14 = vsel %vm174_vm0, %v172_v2, 0.0 }
  0x1d   : > { %v194_v5 = vmax.f32 %v192_v1, %v193_v3  ;;  %v200_v6 = vrot.slane %v199_v4, 4  ;;  %v183_v19 = vrot.slane %v182_v14, 4  ;;  %v177_v20 = vadd.f32 %v176_v18, %v175_v13 }
  0x1f   : > { %v195_v7 = vrot.slane %v194_v5, 2  ;;  %v201_v8 = vmax.f32 %v199_v4, %v200_v6  ;;  %v184_v21 = vadd.f32 %v183_v19, %v182_v14  ;;  %v178_v22 = vrot.slane %v177_v20, 2 }
  0x21   : > { %v196_v9 = vmax.f32 %v194_v5, %v195_v7  ;;  %v202_v10 = vrot.slane %v201_v8, 2  ;;  %v185_v23 = vrot.slane %v184_v21, 2  ;;  %v179_v24 = vadd.f32 %v178_v22, %v177_v20 }
  0x23   : > { %v197_v11 = vrot.slane %v196_v9, 1  ;;  %v203_v12 = vmax.f32 %v201_v8, %v202_v10  ;;  %v186_v25 = vadd.f32 %v185_v23, %v184_v21  ;;  %v180_v26 = vrot.slane %v179_v24, 1 }
  0x25   : > { %v1911_v15 = vmax.f32 %v196_v9, %v197_v11  ;;  %v204_v16 = vrot.slane %v203_v12, 1  ;;  %v187_v27 = vrot.slane %v186_v25, 1  ;;  %v181_v28 = vadd.f32 %v180_v26, %v179_v24 }
  0x27   : > { %274 = vrot.lane.b32.xlu1 %v1911_v15, %s1807_s30  ;;  %271 = vrot.lane.b32.xlu0 %v1911_v15, %s1808_s4  ;;  %v1917_v17 = vmax.f32 %v203_v12, %v204_v16  ;;  %v188_v29 = vadd.f32 %v187_v27, %v186_v25  ;;  %v1943_v30 = vmul.f32 0.25, %v181_v28 }
  0x29   : > { %v1945_v31 = vmul.f32 0.25, %v188_v29 }
  0x2b   : > { %277 = vrot.lane.b32.xlu0 %v1911_v15, %s1809_s5  ;;  %296 = vrot.lane.b32.xlu1 %v1917_v17, %s1807_s30 }
  0x2f   : > { %280 = vrot.lane.b32.xlu0 %v1911_v15, %s1810_s6  ;;  %299 = vrot.lane.b32.xlu1 %v1917_v17, %s1809_s5 }
  0x33   : > { %283 = vrot.lane.b32.xlu0 %v1911_v15, %s1811_s7  ;;  %302 = vrot.lane.b32.xlu1 %v1917_v17, %s1810_s6 }
  0x37   : > { %286 = vrot.lane.b32.xlu0 %v1911_v15, %s1812_s8  ;;  %305 = vrot.lane.b32.xlu1 %v1917_v17, %s1811_s7 }
  0x3b   : > { %308 = vrot.lane.b32.xlu1 %v1917_v17, %s1812_s8  ;;  %293 = vrot.lane.b32.xlu0 %v1917_v17, %s1808_s4 }
  0x3f   : > { %311 = vrot.lane.b32.xlu1 %v1917_v17, %s1813_s9  ;;  %289 = vrot.lane.b32.xlu0 %v1911_v15, %s1813_s9 }
  0x43   : > { %207 = vrot.lane.b32.xlu0 %v1943_v30, %s1808_s4  ;;  %229 = vrot.lane.b32.xlu1 %v1945_v31, %s1808_s4 }
  0x47   : > { %210 = vrot.lane.b32.xlu0 %v1943_v30, %s1807_s30  ;;  %232 = vrot.lane.b32.xlu1 %v1945_v31, %s1807_s30 }
  0x4b   : > { %213 = vrot.lane.b32.xlu0 %v1943_v30, %s1809_s5  ;;  %235 = vrot.lane.b32.xlu1 %v1945_v31, %s1809_s5 }
  0x4f   : > { %216 = vrot.lane.b32.xlu0 %v1943_v30, %s1810_s6  ;;  %238 = vrot.lane.b32.xlu1 %v1945_v31, %s1810_s6 }
  0x53   : > { %219 = vrot.lane.b32.xlu0 %v1943_v30, %s1811_s7  ;;  %241 = vrot.lane.b32.xlu1 %v1945_v31, %s1811_s7 }
  0x57   : > { %222 = vrot.lane.b32.xlu0 %v1943_v30, %s1812_s8  ;;  %244 = vrot.lane.b32.xlu1 %v1945_v31, %s1812_s8 }
  0x5b   : > { %225 = vrot.lane.b32.xlu0 %v1943_v30, %s1813_s9  ;;  %247 = vrot.lane.b32.xlu1 %v1945_v31, %s1813_s9 }
  0x99   : > { %v275_v32 = vpop.permute.xlu1 %274  ;;  %v272_v33 = vpop.permute.xlu0 %271 }
  0x9a   : > { %v314_v42 = vsel %vm250_vm1, %v1911_v15, %v272_v33 }
  0x9b   : > { %v315_v43 = vsel %vm252_vm2, %v314_v42, %v275_v32 }
  0x9d   : > { %v278_v34 = vpop.permute.xlu0 %277  ;;  %v297_v35 = vpop.permute.xlu1 %296 }
  0x9e   : > { %v316_v46 = vsel %vm254_vm3, %v315_v43, %v278_v34 }
  0xa1   : > { %v281_v36 = vpop.permute.xlu0 %280  ;;  %v300_v37 = vpop.permute.xlu1 %299 }
  0xa2   : > { %v317_v48 = vsel %vm174_vm0, %v316_v46, %v281_v36 }
  0xa5   : > { %v284_v38 = vpop.permute.xlu0 %283  ;;  %v303_v39 = vpop.permute.xlu1 %302 }
  0xa6   : > { %v318_v50 = vsel %vm257_vm4, %v317_v48, %v284_v38 }
  0xa9   : > { %v287_v40 = vpop.permute.xlu0 %286  ;;  %v306_v41 = vpop.permute.xlu1 %305 }
  0xaa   : > { %v319_v52 = vsel %vm259_vm5, %v318_v50, %v287_v40  ;;  %v1619_v50 = vld [vmem:[%s2395_s0 + $0x7] ss:$0 sm:$0xff] }
  0xad   : > { %v309_v44 = vpop.permute.xlu1 %308  ;;  %v294_v45 = vpop.permute.xlu0 %293 }
  0xae   : > { %v321_v47 = vsel %vm250_vm1, %v1917_v17, %v294_v45 }
  0xaf   : > { %v322_v49 = vsel %vm252_vm2, %v321_v47, %v297_v35 }
  0xb0   : > { %v323_v51 = vsel %vm254_vm3, %v322_v49, %v300_v37 }
  0xb1   : > { %v312_v53 = vpop.permute.xlu1 %311  ;;  %v290_v54 = vpop.permute.xlu0 %289  ;;  %v324_v55 = vsel %vm174_vm0, %v323_v51, %v303_v39 }
  0xb2   : > { %v320_v56 = vsel %vm261_vm6, %v319_v52, %v290_v54  ;;  %v325_v57 = vsel %vm257_vm4, %v324_v55, %v306_v41 }
  0xb3   : > { %354 = vrot.lane.b32.xlu0 %v320_v56, %s1814_s10  ;;  %v326_v58 = vsel %vm259_vm5, %v325_v57, %v309_v44  ;;  %v1620_v57 = vld [vmem:[%s2395_s0 + $0xe] ss:$0 sm:$0xff] }
  0xb4   : > { %v327_v59 = vsel %vm261_vm6, %v326_v58, %v312_v53 }
  0xb5   : > { %v208_v60 = vpop.permute.xlu0 %207  ;;  %356 = vrot.lane.b32.xlu1 %v327_v59, %s1814_s10  ;;  %v230_v61 = vpop.permute.xlu1 %229 }
  0xb6   : > { %v263_v6 = vsel %vm250_vm1, %v1945_v31, %v230_v61  ;;  %v251_v7 = vsel %vm250_vm1, %v1943_v30, %v208_v60  ;;  %v1618_v60 = vld [vmem:[%s2395_s0] ss:$0 sm:$0xff] }
  0xb9   : > { %v211_v62 = vpop.permute.xlu0 %210  ;;  %v233_v63 = vpop.permute.xlu1 %232 }
  0xba   : > { %v253_v8 = vsel %vm252_vm2, %v251_v7, %v211_v62  ;;  %v264_v9 = vsel %vm252_vm2, %v263_v6, %v233_v63 }
  0xbd   : > { %v214_v0 = vpop.permute.xlu0 %213  ;;  %v236_v1 = vpop.permute.xlu1 %235 }
  0xbe   : > { %v255_v12 = vsel %vm254_vm3, %v253_v8, %v214_v0  ;;  %v265_v13 = vsel %vm254_vm3, %v264_v9, %v236_v1 }
  0xc1   : > { %v217_v2 = vpop.permute.xlu0 %216  ;;  %v239_v3 = vpop.permute.xlu1 %238 }
  0xc2   : > { %v256_v14 = vsel %vm174_vm0, %v255_v12, %v217_v2  ;;  %v266_v15 = vsel %vm174_vm0, %v265_v13, %v239_v3  ;;  %v1621_v2 = vld [vmem:[%s2395_s0 + $0x15] ss:$0 sm:$0xff]  ;;  %v1622_v13 = vld [vmem:[%s2395_s0 + $0x1c] ss:$0 sm:$0xff] }
  0xc5   : > { %v220_v4 = vpop.permute.xlu0 %219  ;;  %v242_v5 = vpop.permute.xlu1 %241 }
  0xc6   : > { %v258_v16 = vsel %vm257_vm4, %v256_v14, %v220_v4  ;;  %v267_v17 = vsel %vm257_vm4, %v266_v15, %v242_v5 }
  0xc9   : > { %v223_v10 = vpop.permute.xlu0 %222  ;;  %v245_v11 = vpop.permute.xlu1 %244 }
  0xca   : > { %v260_v18 = vsel %vm259_vm5, %v258_v16, %v223_v10  ;;  %v268_v19 = vsel %vm259_vm5, %v267_v17, %v245_v11 }
  0xcd   : > { %v226_v20 = vpop.permute.xlu0 %225  ;;  %v248_v21 = vpop.permute.xlu1 %247 }
  0xce   : > { %v262_v22 = vsel %vm261_vm6, %v260_v18, %v226_v20  ;;  %v269_v23 = vsel %vm261_vm6, %v268_v19, %v248_v21 }
  0xcf   : > { %330 = vrot.lane.b32.xlu0 %v262_v22, %s1814_s10  ;;  %332 = vrot.lane.b32.xlu1 %v269_v23, %s1814_s10  ;;  %s1825_s10 = smov 10  }
 0x125   : > { %v355_v24 = vpop.permute.xlu0 %354 }
 0x126   : > { %v360_v25 = vsel %vm336_vm7, 0.0, %v355_v24  ;;  %v1623_v24 = vld [vmem:[%s2395_s0 + $0x23] ss:$0 sm:$0xff] }
 0x127   : > { %v362_v26 = vsel %vm339_vm8, %v360_v25, 0.0  ;;  %v357_v27 = vpop.permute.xlu1 %356 }
 0x128   : > { %v366_v28 = vrot.slane %v362_v26, 5  ;;  %v361_v29 = vsel %vm336_vm7, 0.0, %v357_v27 }
 0x129   : > { %v363_v30 = vsel %vm339_vm8, %v361_v29, 0.0 }
 0x12a   : > { %v371_v31 = vsel %vm254_vm3, 0.0, %v366_v28  ;;  %v367_v32 = vrot.slane %v363_v30, 5 }
 0x12b   : > { %375 = vrot.lane.b32.xlu0 %v371_v31, %s1813_s9 }
 0x12c   : > { %v368_v33 = vsel %vm254_vm3, %v366_v28, %v367_v32  ;;  %v372_v34 = vsel %vm254_vm3, %v367_v32, 0.0 }
 0x12d   : > { %377 = vrot.lane.b32.xlu1 %v368_v33, %s1813_s9 }
 0x12f   : > { %379 = vrot.lane.b32.xlu0 %v372_v34, %s1813_s9 }
 0x133   : > { %528 = vrot.lane.b32.xlu0 %v371_v31, %s1815_s11 }
 0x141   : > { %v331_v35 = vpop.permute.xlu0 %330  ;;  %v333_v36 = vpop.permute.xlu1 %332 }
 0x142   : > { %v337_v37 = vsel %vm336_vm7, 0.0, %v331_v35  ;;  %v338_v38 = vsel %vm336_vm7, 0.0, %v333_v36  ;;  %v1624_v36 = vld [vmem:[%s2395_s0 + $0x2a] ss:$0 sm:$0xff] }
 0x143   : > { %v340_v39 = vsel %vm339_vm8, %v337_v37, 0.0  ;;  %v341_v40 = vsel %vm339_vm8, %v338_v38, 0.0 }
 0x144   : > { %v344_v41 = vrot.slane %v340_v39, 5  ;;  %v345_v42 = vrot.slane %v341_v40, 5 }
 0x146   : > { %v350_v43 = vsel %vm254_vm3, 0.0, %v344_v41  ;;  %v346_v44 = vsel %vm254_vm3, %v344_v41, %v345_v42  ;;  %v351_v45 = vsel %vm254_vm3, %v345_v42, 0.0 }
 0x147   : > { %519 = vrot.lane.b32.xlu1 %v350_v43, %s1816_s12  ;;  %521 = vrot.lane.b32.xlu0 %v346_v44, %s1816_s12 }
 0x14b   : > { %523 = vrot.lane.b32.xlu1 %v351_v45, %s1816_s12  ;;  %532 = vrot.lane.b32.xlu0 %v372_v34, %s1815_s11 }
 0x14f   : > { %530 = vrot.lane.b32.xlu1 %v368_v33, %s1815_s11  ;;  %678 = vrot.lane.b32.xlu0 %v371_v31, %s1817_s13  ;;  %s1826_s11 = smov 122  }
 0x153   : > { %669 = vrot.lane.b32.xlu1 %v350_v43, %s1818_s18  ;;  %671 = vrot.lane.b32.xlu0 %v346_v44, %s1818_s18 }
 0x157   : > { %673 = vrot.lane.b32.xlu1 %v351_v45, %s1818_s18  ;;  %682 = vrot.lane.b32.xlu0 %v372_v34, %s1817_s13 }
 0x15b   : > { %680 = vrot.lane.b32.xlu1 %v368_v33, %s1817_s13  ;;  %828 = vrot.lane.b32.xlu0 %v371_v31, %s1819_s20 }
 0x15f   : > { %819 = vrot.lane.b32.xlu1 %v350_v43, %s1820_s21  ;;  %821 = vrot.lane.b32.xlu0 %v346_v44, %s1820_s21 }
 0x163   : > { %823 = vrot.lane.b32.xlu1 %v351_v45, %s1820_s21  ;;  %832 = vrot.lane.b32.xlu0 %v372_v34, %s1819_s20 }
 0x167   : > { %830 = vrot.lane.b32.xlu1 %v368_v33, %s1819_s20  ;;  %978 = vrot.lane.b32.xlu0 %v371_v31, %s1821_s25  ;;  %s1827_s20 = smov [#allocation3]  }
 0x168   : > { %s1749_s21 = sshll.u32 %s1827_s20, 4  ;;  %s1750_s21 = int_to_ptr.vmem [resolvable:$false] %s1749_s21 }
 0x16b   : > { %969 = vrot.lane.b32.xlu1 %v350_v43, %s1822_s26  ;;  %971 = vrot.lane.b32.xlu0 %v346_v44, %s1822_s26 }
 0x16f   : > { %973 = vrot.lane.b32.xlu1 %v351_v45, %s1822_s26  ;;  %982 = vrot.lane.b32.xlu0 %v372_v34, %s1821_s25 }
 0x173   : > { %980 = vrot.lane.b32.xlu1 %v368_v33, %s1821_s25  ;;  %1128 = vrot.lane.b32.xlu0 %v371_v31, %s1823_s27 }
 0x177   : > { %1119 = vrot.lane.b32.xlu1 %v350_v43, %s1824_s28  ;;  %1121 = vrot.lane.b32.xlu0 %v346_v44, %s1824_s28 }
 0x17b   : > { %1123 = vrot.lane.b32.xlu1 %v351_v45, %s1824_s28  ;;  %1132 = vrot.lane.b32.xlu0 %v372_v34, %s1823_s27 }
 0x17f   : > { %1130 = vrot.lane.b32.xlu1 %v368_v33, %s1823_s27  ;;  %1278 = vrot.lane.b32.xlu0 %v371_v31, %s1825_s10 }
 0x183   : > { %1269 = vrot.lane.b32.xlu1 %v350_v43, %s1826_s11  ;;  %1271 = vrot.lane.b32.xlu0 %v346_v44, %s1826_s11 }
 0x187   : > { %1273 = vrot.lane.b32.xlu1 %v351_v45, %s1826_s11  ;;  %1282 = vrot.lane.b32.xlu0 %v372_v34, %s1825_s10  ;;  %s1429_s11 = sld [smem:[#allocation2]] }
 0x18b   : > { %1280 = vrot.lane.b32.xlu1 %v368_v33, %s1825_s10 }
 0x19d   : > { %v376_v46 = vpop.permute.xlu0 %375 }
 0x19e   : > { %v385_v49 = vsel %vm384_vm9, %v350_v43, %v376_v46 }
 0x19f   : > { %v378_v47 = vpop.permute.xlu1 %377  ;;  %v402_v55 = vmul.f32 %v1619_v50, %v385_v49  ;;  %v422_v1 = vmul.f32 %v1620_v57, %v385_v49  ;;  %v393_v4 = vmul.f32 %v1618_v60, %v385_v49  ;;  %v442_v12 = vmul.f32 %v1621_v2, %v385_v49 }
 0x1a0   : > { %v386_v48 = vsel %vm384_vm9, %v346_v44, %v378_v47  ;;  %v462_v23 = vmul.f32 %v1622_v13, %v385_v49  ;;  %v482_v35 = vmul.f32 %v1623_v24, %v385_v49  ;;  %v502_v44 = vmul.f32 %v1624_v36, %v385_v49 }
 0x1a1   : > { %v380_v51 = vpop.permute.xlu0 %379  ;;  %v403_v53 = vmul.f32 %v1619_v50, %v386_v48  ;;  %v408_v61 = vrot.slane %v402_v55, 1  ;;  %v423_v62 = vmul.f32 %v1620_v57, %v386_v48  ;;  %v394_v0 = vmul.f32 %v1618_v60, %v386_v48 }
 0x1a2   : > { %v387_v52 = vsel %vm384_vm9, %v351_v45, %v380_v51  ;;  %v443_v9 = vmul.f32 %v1621_v2, %v386_v48  ;;  %v428_v11 = vrot.slane %v422_v1, 2  ;;  %v463_v20 = vmul.f32 %v1622_v13, %v386_v48 }
 0x1a3   : > { %v404_v54 = vmul.f32 %v1619_v50, %v387_v52  ;;  %v409_v58 = vrot.slane %v403_v53, 1  ;;  %v424_v59 = vmul.f32 %v1620_v57, %v387_v52  ;;  %v444_v6 = vmul.f32 %v1621_v2, %v387_v52 }
 0x1a4   : > { %v429_v8 = vrot.slane %v423_v62, 2  ;;  %v464_v16 = vmul.f32 %v1622_v13, %v387_v52  ;;  %v449_v19 = vrot.slane %v443_v9, 3  ;;  %v448_v22 = vrot.slane %v442_v12, 3  ;;  %v1628_v62 = vld [vmem:[%s2395_s0 + $0x16] ss:$0 sm:$0xff] }
 0x1a5   : > { %v411_v56 = vrot.slane %v404_v54, 1  ;;  %v410_v3 = vsel %vm261_vm6, %v408_v61, %v409_v58  ;;  %v431_v5 = vrot.slane %v424_v59, 2  ;;  %v451_v15 = vrot.slane %v444_v6, 3  ;;  %v529_v33 = vpop.permute.xlu0 %528  ;;  %v1626_v59 = vld [vmem:[%s2395_s0 + $0x8] ss:$0 sm:$0xff] }
 0x1a6   : > { %v415_v10 = vadd.f32 %v410_v3, %v393_v4  ;;  %v430_v17 = vsel %vm259_vm5, %v428_v11, %v429_v8  ;;  %v471_v26 = vrot.slane %v464_v16, 4  ;;  %v484_v27 = vmul.f32 %v1623_v24, %v387_v52  ;;  %v1627_v61 = vld [vmem:[%s2395_s0 + $0xf] ss:$0 sm:$0xff]  ;;  %v1630_v3 = vld [vmem:[%s2395_s0 + $0x24] ss:$0 sm:$0xff] }
 0x1a7   : > { %v412_v63 = vsel %vm261_vm6, %v409_v58, %v411_v56  ;;  %v432_v14 = vsel %vm259_vm5, %v429_v8, %v431_v5  ;;  %v452_v25 = vsel %vm257_vm4, %v449_v19, %v451_v15  ;;  %v450_v28 = vsel %vm257_vm4, %v448_v22, %v449_v19  ;;  %v1631_v4 = vld [vmem:[%s2395_s0 + $0x2b] ss:$0 sm:$0xff] }
 0x1a8   : > { %v416_v7 = vadd.f32 %v412_v63, %v394_v0  ;;  %v435_v21 = vadd.f32 %v430_v17, %v415_v10  ;;  %v469_v30 = vrot.slane %v463_v20, 4  ;;  %v483_v31 = vmul.f32 %v1623_v24, %v386_v48  ;;  %v1629_v63 = vld [vmem:[%s2395_s0 + $0x1d] ss:$0 sm:$0xff] }
 0x1a9   : > { %v468_v34 = vrot.slane %v462_v23, 4  ;;  %v491_v38 = vrot.slane %v484_v27, 5  ;;  %v503_v39 = vmul.f32 %v1624_v36, %v386_v48  ;;  %v504_v40 = vmul.f32 %v1624_v36, %v387_v52  ;;  %v1625_v48 = vld [vmem:[%s2395_s0 + $0x1] ss:$0 sm:$0xff] }
 0x1aa   : > { %v436_v18 = vadd.f32 %v432_v14, %v416_v7  ;;  %v455_v32 = vadd.f32 %v450_v28, %v435_v21  ;;  %v472_v37 = vsel %vm174_vm0, %v469_v30, %v471_v26  ;;  %v489_v43 = vrot.slane %v483_v31, 5 }
 0x1ab   : > { %v470_v41 = vsel %vm174_vm0, %v468_v34, %v469_v30  ;;  %v488_v50 = vrot.slane %v482_v35, 5  ;;  %v509_v53 = vrot.slane %v503_v39, 6  ;;  %v511_v54 = vrot.slane %v504_v40, 6 }
 0x1ac   : > { %v456_v29 = vadd.f32 %v452_v25, %v436_v18  ;;  %v475_v45 = vadd.f32 %v470_v41, %v455_v32  ;;  %v492_v51 = vsel %vm254_vm3, %v489_v43, %v491_v38  ;;  %v508_v57 = vrot.slane %v502_v44, 6 }
 0x1ad   : > { %v490_v55 = vsel %vm254_vm3, %v488_v50, %v489_v43  ;;  %v512_v1 = vsel %vm252_vm2, %v509_v53, %v511_v54 }
 0x1ae   : > { %v476_v42 = vadd.f32 %v472_v37, %v456_v29  ;;  %v495_v58 = vadd.f32 %v490_v55, %v475_v45  ;;  %v510_v2 = vsel %vm252_vm2, %v508_v57, %v509_v53 }
 0x1b0   : > { %v496_v56 = vadd.f32 %v492_v51, %v476_v42  ;;  %v515_v9 = vadd.f32 %v510_v2, %v495_v58 }
 0x1b2   : > { %v516_v5 = vadd.f32 %v512_v1, %v496_v56 }
 0x1b9   : > { %v522_v46 = vpop.permute.xlu0 %521  ;;  %v520_v47 = vpop.permute.xlu1 %519 }
 0x1ba   : > { %v537_v52 = vsel %vm384_vm9, %v520_v47, %v529_v33 }
 0x1bb   : > { %v545_v6 = vmul.f32 %v1625_v48, %v537_v52  ;;  %v554_v7 = vmul.f32 %v1626_v59, %v537_v52  ;;  %v574_v10 = vmul.f32 %v1627_v61, %v537_v52  ;;  %v594_v11 = vmul.f32 %v1628_v62, %v537_v52 }
 0x1bc   : > { %v614_v12 = vmul.f32 %v1629_v63, %v537_v52  ;;  %v2087_v15 = vmul.f32 %v1630_v3, %v537_v52  ;;  %v2089_v16 = vmul.f32 %v1631_v4, %v537_v52 }
 0x1bd   : > { %v533_v49 = vpop.permute.xlu0 %532  ;;  %v524_v60 = vpop.permute.xlu1 %523  ;;  %v547_v23 = vadd.f32 %v545_v6, %v515_v9  ;;  %v560_v24 = vrot.slane %v554_v7, 1  ;;  %v580_v33 = vrot.slane %v574_v10, 2  ;;  %v600_v34 = vrot.slane %v594_v11, 3  ;;  %v1634_v10 = vld [vmem:[%s2395_s0 + $0x10] ss:$0 sm:$0xff] }
 0x1be   : > { %v539_v0 = vsel %vm384_vm9, %v524_v60, %v533_v49  ;;  %v620_v54 = vrot.slane %v614_v12, 4  ;;  %v660_v7 = vrot.slane %v2089_v16, 6 }
 0x1bf   : > { %v556_v8 = vmul.f32 %v1626_v59, %v539_v0  ;;  %v576_v17 = vmul.f32 %v1627_v61, %v539_v0  ;;  %v596_v26 = vmul.f32 %v1628_v62, %v539_v0  ;;  %v616_v36 = vmul.f32 %v1629_v63, %v539_v0 }
 0x1c0   : > { %v636_v41 = vmul.f32 %v1630_v3, %v539_v0  ;;  %v656_v55 = vmul.f32 %v1631_v4, %v539_v0  ;;  %v1632_v0 = vld [vmem:[%s2395_s0 + $0x2] ss:$0 sm:$0xff] }
 0x1c1   : > { %v679_v13 = vpop.permute.xlu0 %678  ;;  %v531_v14 = vpop.permute.xlu1 %530  ;;  %v563_v25 = vrot.slane %v556_v8, 1  ;;  %v583_v35 = vrot.slane %v576_v17, 2  ;;  %v603_v45 = vrot.slane %v596_v26, 3  ;;  %v623_v58 = vrot.slane %v616_v36, 4 }
 0x1c2   : > { %v538_v18 = vsel %vm384_vm9, %v522_v46, %v531_v14  ;;  %v663_v11 = vrot.slane %v656_v55, 6  ;;  %v1635_v14 = vld [vmem:[%s2395_s0 + $0x17] ss:$0 sm:$0xff] }
 0x1c3   : > { %v546_v19 = vmul.f32 %v1625_v48, %v538_v18  ;;  %v555_v20 = vmul.f32 %v1626_v59, %v538_v18  ;;  %v575_v21 = vmul.f32 %v1627_v61, %v538_v18  ;;  %v595_v22 = vmul.f32 %v1628_v62, %v538_v18 }
 0x1c4   : > { %v615_v30 = vmul.f32 %v1629_v63, %v538_v18  ;;  %v635_v40 = vmul.f32 %v1630_v3, %v538_v18  ;;  %v655_v44 = vmul.f32 %v1631_v4, %v538_v18  ;;  %v640_v59 = vrot.slane %v2087_v15, 5  ;;  %v1633_v4 = vld [vmem:[%s2395_s0 + $0x9] ss:$0 sm:$0xff]  ;;  %v1636_v15 = vld [vmem:[%s2395_s0 + $0x1e] ss:$0 sm:$0xff] }
 0x1c5   : > { %v548_v27 = vadd.f32 %v546_v19, %v516_v5  ;;  %v561_v28 = vrot.slane %v555_v20, 1  ;;  %v581_v29 = vrot.slane %v575_v21, 2  ;;  %v672_v31 = vpop.permute.xlu0 %671  ;;  %v670_v32 = vpop.permute.xlu1 %669  ;;  %v601_v39 = vrot.slane %v595_v22, 3  ;;  %v1637_v21 = vld [vmem:[%s2395_s0 + $0x25] ss:$0 sm:$0xff] }
 0x1c6   : > { %v621_v50 = vrot.slane %v615_v30, 4  ;;  %v641_v49 = vrot.slane %v635_v40, 5  ;;  %v661_v62 = vrot.slane %v655_v44, 6  ;;  %v643_v63 = vrot.slane %v636_v41, 5  ;;  %v1638_v22 = vld [vmem:[%s2395_s0 + $0x2c] ss:$0 sm:$0xff] }
 0x1c7   : > { %v562_v37 = vsel %vm261_vm6, %v560_v24, %v561_v28  ;;  %v564_v38 = vsel %vm261_vm6, %v561_v28, %v563_v25  ;;  %v582_v46 = vsel %vm259_vm5, %v580_v33, %v581_v29  ;;  %v584_v47 = vsel %vm259_vm5, %v581_v29, %v583_v35 }
 0x1c8   : > { %v567_v42 = vadd.f32 %v562_v37, %v547_v23  ;;  %v568_v43 = vadd.f32 %v564_v38, %v548_v27  ;;  %v602_v48 = vsel %vm257_vm4, %v600_v34, %v601_v39  ;;  %v604_v52 = vsel %vm257_vm4, %v601_v39, %v603_v45 }
 0x1c9   : > { %v683_v51 = vpop.permute.xlu0 %682  ;;  %v674_v53 = vpop.permute.xlu1 %673  ;;  %v622_v1 = vsel %vm174_vm0, %v620_v54, %v621_v50  ;;  %v624_v2 = vsel %vm174_vm0, %v621_v50, %v623_v58  ;;  %v687_v3 = vsel %vm384_vm9, %v670_v32, %v679_v13  ;;  %v642_v12 = vsel %vm254_vm3, %v640_v59, %v641_v49 }
 0x1ca   : > { %v587_v56 = vadd.f32 %v582_v46, %v567_v42  ;;  %v588_v57 = vadd.f32 %v584_v47, %v568_v43  ;;  %v644_v13 = vsel %vm254_vm3, %v641_v49, %v643_v63  ;;  %v689_v16 = vsel %vm384_vm9, %v674_v53, %v683_v51 }
 0x1cb   : > { %v662_v18 = vsel %vm252_vm2, %v660_v7, %v661_v62  ;;  %v695_v19 = vmul.f32 %v1632_v0, %v687_v3  ;;  %v704_v20 = vmul.f32 %v1633_v4, %v687_v3  ;;  %v724_v23 = vmul.f32 %v1634_v10, %v687_v3 }
 0x1cc   : > { %v607_v60 = vadd.f32 %v602_v48, %v587_v56  ;;  %v608_v61 = vadd.f32 %v604_v52, %v588_v57  ;;  %v706_v24 = vmul.f32 %v1633_v4, %v689_v16  ;;  %v744_v29 = vmul.f32 %v1635_v14, %v687_v3 }
 0x1cd   : > { %v2108_v5 = vpop.permute.xlu0 %828  ;;  %v681_v6 = vpop.permute.xlu1 %680  ;;  %v764_v30 = vmul.f32 %v1636_v15, %v687_v3  ;;  %v664_v32 = vsel %vm252_vm2, %v661_v62, %v663_v11  ;;  %v2132_v33 = vmul.f32 %v1637_v21, %v687_v3  ;;  %v2134_v34 = vmul.f32 %v1638_v22, %v687_v3 }
 0x1ce   : > { %v627_v8 = vadd.f32 %v622_v1, %v607_v60  ;;  %v628_v9 = vadd.f32 %v624_v2, %v608_v61  ;;  %v688_v26 = vsel %vm384_vm9, %v672_v31, %v681_v6  ;;  %v726_v35 = vmul.f32 %v1634_v10, %v689_v16 }
 0x1cf   : > { %v710_v38 = vrot.slane %v704_v20, 1  ;;  %v696_v39 = vmul.f32 %v1632_v0, %v688_v26  ;;  %v705_v40 = vmul.f32 %v1633_v4, %v688_v26  ;;  %v725_v41 = vmul.f32 %v1634_v10, %v688_v26 }
 0x1d0   : > { %v647_v17 = vadd.f32 %v642_v12, %v627_v8  ;;  %v648_v25 = vadd.f32 %v644_v13, %v628_v9  ;;  %v713_v31 = vrot.slane %v706_v24, 1  ;;  %v746_v43 = vmul.f32 %v1635_v14, %v689_v16 }
 0x1d1   : > { %v820_v27 = vpop.permute.xlu1 %819  ;;  %v2136_v37 = vpop.permute.xlu0 %821  ;;  %v745_v44 = vmul.f32 %v1635_v14, %v688_v26  ;;  %v711_v47 = vrot.slane %v705_v40, 1  ;;  %v731_v50 = vrot.slane %v725_v41, 2  ;;  %v765_v51 = vmul.f32 %v1636_v15, %v688_v26 }
 0x1d2   : > { %v667_v28 = vadd.f32 %v662_v18, %v647_v17  ;;  %v668_v36 = vadd.f32 %v664_v32, %v648_v25  ;;  %v730_v53 = vrot.slane %v724_v23, 2  ;;  %v750_v54 = vrot.slane %v744_v29, 3  ;;  %v1640_v18 = vld [vmem:[%s2395_s0 + $0xa] ss:$0 sm:$0xff]  ;;  %v1641_v23 = vld [vmem:[%s2395_s0 + $0x11] ss:$0 sm:$0xff] }
 0x1d3   : > { %v733_v55 = vrot.slane %v726_v35, 2  ;;  %v766_v56 = vmul.f32 %v1636_v15, %v689_v16  ;;  %v712_v57 = vsel %vm261_vm6, %v710_v38, %v711_v47  ;;  %v714_v58 = vsel %vm261_vm6, %v711_v47, %v713_v31  ;;  %v1643_v35 = vld [vmem:[%s2395_s0 + $0x1f] ss:$0 sm:$0xff] }
 0x1d4   : > { %v697_v42 = vadd.f32 %v695_v19, %v667_v28  ;;  %v698_v46 = vadd.f32 %v696_v39, %v668_v36  ;;  %v751_v48 = vrot.slane %v745_v44, 3  ;;  %v785_v52 = vmul.f32 %v1637_v21, %v688_v26 }
 0x1d5   : > { %v824_v45 = vpop.permute.xlu1 %823  ;;  %v786_v49 = vmul.f32 %v1637_v21, %v689_v16  ;;  %v805_v61 = vmul.f32 %v1638_v22, %v688_v26  ;;  %v833_v62 = vpop.permute.xlu0 %832  ;;  %v753_v1 = vrot.slane %v746_v43, 3  ;;  %v732_v2 = vsel %vm259_vm5, %v730_v53, %v731_v50 }
 0x1d6   : > { %v717_v59 = vadd.f32 %v712_v57, %v697_v42  ;;  %v718_v60 = vadd.f32 %v714_v58, %v698_v46  ;;  %v734_v0 = vsel %vm259_vm5, %v731_v50, %v733_v55  ;;  %v771_v3 = vrot.slane %v765_v51, 4  ;;  %v1645_v42 = vld [vmem:[%s2395_s0 + $0x2d] ss:$0 sm:$0xff] }
 0x1d7   : > { %v770_v4 = vrot.slane %v764_v30, 4  ;;  %v806_v6 = vmul.f32 %v1638_v22, %v689_v16  ;;  %v773_v9 = vrot.slane %v766_v56, 4  ;;  %v752_v10 = vsel %vm257_vm4, %v750_v54, %v751_v48  ;;  %v1639_v22 = vld [vmem:[%s2395_s0 + $0x3] ss:$0 sm:$0xff] }
 0x1d8   : > { %v737_v7 = vadd.f32 %v732_v2, %v717_v59  ;;  %v738_v8 = vadd.f32 %v734_v0, %v718_v60  ;;  %v754_v11 = vsel %vm257_vm4, %v751_v48, %v753_v1  ;;  %v791_v12 = vrot.slane %v785_v52, 5 }
 0x1d9   : > { %v831_v63 = vpop.permute.xlu1 %830  ;;  %v811_v15 = vrot.slane %v805_v61, 6  ;;  %v837_v17 = vsel %vm384_vm9, %v820_v27, %v2108_v5  ;;  %v790_v16 = vrot.slane %v2132_v33, 5  ;;  %v793_v19 = vrot.slane %v786_v49, 5  ;;  %v1642_v27 = vld [vmem:[%s2395_s0 + $0x18] ss:$0 sm:$0xff]  ;;  %v979_v28 = vpop.permute.xlu0 %978 }
 0x1da   : > { %v757_v13 = vadd.f32 %v752_v10, %v737_v7  ;;  %v758_v14 = vadd.f32 %v754_v11, %v738_v8  ;;  %v772_v20 = vsel %vm174_vm0, %v770_v4, %v771_v3  ;;  %v774_v21 = vsel %vm174_vm0, %v771_v3, %v773_v9 }
 0x1db   : > { %v810_v5 = vrot.slane %v2134_v34, 6  ;;  %v813_v24 = vrot.slane %v806_v6, 6  ;;  %v792_v30 = vsel %vm254_vm3, %v790_v16, %v791_v12  ;;  %v794_v32 = vsel %vm254_vm3, %v791_v12, %v793_v19  ;;  %v1644_v34 = vld [vmem:[%s2395_s0 + $0x26] ss:$0 sm:$0xff] }
 0x1dc   : > { %v777_v25 = vadd.f32 %v772_v20, %v757_v13  ;;  %v778_v26 = vadd.f32 %v774_v21, %v758_v14  ;;  %v854_v33 = vmul.f32 %v1640_v18, %v837_v17  ;;  %v839_v36 = vsel %vm384_vm9, %v824_v45, %v833_v62 }
 0x1dd   : > { %v970_v29 = vpop.permute.xlu1 %969  ;;  %v812_v39 = vsel %vm252_vm2, %v810_v5, %v811_v15  ;;  %v845_v40 = vmul.f32 %v1639_v22, %v837_v17  ;;  %v874_v41 = vmul.f32 %v1641_v23, %v837_v17  ;;  %v894_v31 = vmul.f32 %v1642_v27, %v837_v17  ;;  %v2182_v49 = vpop.permute.xlu0 %971 }
 0x1de   : > { %v797_v38 = vadd.f32 %v792_v30, %v777_v25  ;;  %v856_v43 = vmul.f32 %v1640_v18, %v839_v36  ;;  %v798_v44 = vadd.f32 %v794_v32, %v778_v26  ;;  %v838_v46 = vsel %vm384_vm9, %v2136_v37, %v831_v63  ;;  %v1647_v32 = vld [vmem:[%s2395_s0 + $0xb] ss:$0 sm:$0xff] }
 0x1df   : > { %v914_v50 = vmul.f32 %v1643_v35, %v837_v17  ;;  %v2177_v51 = vmul.f32 %v1644_v34, %v837_v17  ;;  %v814_v45 = vsel %vm252_vm2, %v811_v15, %v813_v24  ;;  %v860_v53 = vrot.slane %v854_v33, 1 }
 0x1e0   : > { %v817_v47 = vadd.f32 %v812_v39, %v797_v38  ;;  %v2180_v54 = vmul.f32 %v1645_v42, %v837_v17  ;;  %v876_v55 = vmul.f32 %v1641_v23, %v839_v36  ;;  %v818_v56 = vadd.f32 %v814_v45, %v798_v44 }
 0x1e1   : > { %v880_v57 = vrot.slane %v874_v41, 2  ;;  %v846_v58 = vmul.f32 %v1639_v22, %v838_v46  ;;  %v855_v48 = vmul.f32 %v1640_v18, %v838_v46  ;;  %v875_v52 = vmul.f32 %v1641_v23, %v838_v46  ;;  %v974_v59 = vpop.permute.xlu1 %973  ;;  %v983_v20 = vpop.permute.xlu0 %982  ;;  %v1646_v41 = vld [vmem:[%s2395_s0 + $0x4] ss:$0 sm:$0xff] }
 0x1e2   : > { %v847_v60 = vadd.f32 %v845_v40, %v817_v47  ;;  %v863_v37 = vrot.slane %v856_v43, 1  ;;  %v896_v61 = vmul.f32 %v1642_v27, %v839_v36  ;;  %v895_v62 = vmul.f32 %v1642_v27, %v838_v46  ;;  %v1651_v47 = vld [vmem:[%s2395_s0 + $0x27] ss:$0 sm:$0xff] }
 0x1e3   : > { %v848_v63 = vadd.f32 %v846_v58, %v818_v56  ;;  %v861_v1 = vrot.slane %v855_v48, 1  ;;  %v881_v2 = vrot.slane %v875_v52, 2  ;;  %v915_v0 = vmul.f32 %v1643_v35, %v838_v46 }
 0x1e4   : > { %v900_v3 = vrot.slane %v894_v31, 3  ;;  %v920_v4 = vrot.slane %v914_v50, 4  ;;  %v883_v6 = vrot.slane %v876_v55, 2  ;;  %v916_v7 = vmul.f32 %v1643_v35, %v839_v36  ;;  %v1652_v55 = vld [vmem:[%s2395_s0 + $0x2e] ss:$0 sm:$0xff] }
 0x1e5   : > { %v862_v8 = vsel %vm261_vm6, %v860_v53, %v861_v1  ;;  %v864_v9 = vsel %vm261_vm6, %v861_v1, %v863_v37  ;;  %v901_v10 = vrot.slane %v895_v62, 3  ;;  %v935_v11 = vmul.f32 %v1644_v34, %v838_v46  ;;  %v981_v21 = vpop.permute.xlu1 %980  ;;  %v2219_v56 = vpop.permute.xlu0 %1128 }
 0x1e6   : > { %v903_v12 = vrot.slane %v896_v61, 3  ;;  %v936_v13 = vmul.f32 %v1644_v34, %v839_v36  ;;  %v867_v14 = vadd.f32 %v862_v8, %v847_v60  ;;  %v868_v15 = vadd.f32 %v864_v9, %v848_v63 }
 0x1e7   : > { %v882_v17 = vsel %vm259_vm5, %v880_v57, %v881_v2  ;;  %v884_v18 = vsel %vm259_vm5, %v881_v2, %v883_v6  ;;  %v921_v16 = vrot.slane %v915_v0, 4  ;;  %v955_v19 = vmul.f32 %v1645_v42, %v838_v46  ;;  %v1650_v46 = vld [vmem:[%s2395_s0 + $0x20] ss:$0 sm:$0xff] }
 0x1e8   : > { %v956_v22 = vmul.f32 %v1645_v42, %v839_v36  ;;  %v887_v23 = vadd.f32 %v882_v17, %v867_v14  ;;  %v888_v5 = vadd.f32 %v884_v18, %v868_v15  ;;  %v987_v24 = vsel %vm384_vm9, %v970_v29, %v979_v28  ;;  %v1648_v28 = vld [vmem:[%s2395_s0 + $0x12] ss:$0 sm:$0xff]  ;;  %v1649_v42 = vld [vmem:[%s2395_s0 + $0x19] ss:$0 sm:$0xff] }
 0x1e9   : > { %v923_v25 = vrot.slane %v916_v7, 4  ;;  %v902_v26 = vsel %vm257_vm4, %v900_v3, %v901_v10  ;;  %v904_v27 = vsel %vm257_vm4, %v901_v10, %v903_v12  ;;  %v941_v30 = vrot.slane %v935_v11, 5  ;;  %v1120_v57 = vpop.permute.xlu1 %1119  ;;  %v2229_v17 = vpop.permute.xlu0 %1121 }
 0x1ea   : > { %v940_v33 = vrot.slane %v2177_v51, 5  ;;  %v960_v35 = vrot.slane %v2180_v54, 6  ;;  %v907_v34 = vadd.f32 %v902_v26, %v887_v23  ;;  %v908_v36 = vadd.f32 %v904_v27, %v888_v5 }
 0x1eb   : > { %v943_v29 = vrot.slane %v936_v13, 5  ;;  %v922_v38 = vsel %vm174_vm0, %v920_v4, %v921_v16  ;;  %v924_v39 = vsel %vm174_vm0, %v921_v16, %v923_v25  ;;  %v961_v40 = vrot.slane %v955_v19, 6 }
 0x1ec   : > { %v927_v31 = vadd.f32 %v922_v38, %v907_v34  ;;  %v928_v43 = vadd.f32 %v924_v39, %v908_v36  ;;  %v1004_v44 = vmul.f32 %v1647_v32, %v987_v24  ;;  %v989_v50 = vsel %vm384_vm9, %v974_v59, %v983_v20 }
 0x1ed   : > { %v963_v51 = vrot.slane %v956_v22, 6  ;;  %v942_v45 = vsel %vm254_vm3, %v940_v33, %v941_v30  ;;  %v944_v53 = vsel %vm254_vm3, %v941_v30, %v943_v29  ;;  %v1024_v54 = vmul.f32 %v1648_v28, %v987_v24  ;;  %v1124_v18 = vpop.permute.xlu1 %1123 }
 0x1ee   : > { %v947_v58 = vadd.f32 %v942_v45, %v927_v31  ;;  %v995_v48 = vmul.f32 %v1646_v41, %v987_v24  ;;  %v1044_v52 = vmul.f32 %v1649_v42, %v987_v24  ;;  %v948_v60 = vadd.f32 %v944_v53, %v928_v43 }
 0x1ef   : > { %v962_v37 = vsel %vm252_vm2, %v960_v35, %v961_v40  ;;  %v1064_v59 = vmul.f32 %v1650_v46, %v987_v24  ;;  %v2222_v61 = vmul.f32 %v1651_v47, %v987_v24  ;;  %v1006_v62 = vmul.f32 %v1647_v32, %v989_v50 }
 0x1f0   : > { %v967_v63 = vadd.f32 %v962_v37, %v947_v58  ;;  %v1010_v1 = vrot.slane %v1004_v44, 1  ;;  %v2224_v2 = vmul.f32 %v1652_v55, %v987_v24  ;;  %v964_v0 = vsel %vm252_vm2, %v961_v40, %v963_v51  ;;  %v1656_v37 = vld [vmem:[%s2395_s0 + $0x1a] ss:$0 sm:$0xff] }
 0x1f1   : > { %v1030_v3 = vrot.slane %v1024_v54, 2  ;;  %v1026_v4 = vmul.f32 %v1648_v28, %v989_v50  ;;  %v968_v6 = vadd.f32 %v964_v0, %v948_v60  ;;  %v988_v7 = vsel %vm384_vm9, %v2182_v49, %v981_v21  ;;  %v1131_v31 = vpop.permute.xlu1 %1130  ;;  %v1653_v54 = vld [vmem:[%s2395_s0 + $0x5] ss:$0 sm:$0xff]  ;;  %v1655_v60 = vld [vmem:[%s2395_s0 + $0x13] ss:$0 sm:$0xff] }
 0x1f2   : > { %v1050_v8 = vrot.slane %v1044_v52, 3  ;;  %v996_v9 = vmul.f32 %v1646_v41, %v988_v7  ;;  %v1005_v10 = vmul.f32 %v1647_v32, %v988_v7  ;;  %v1025_v11 = vmul.f32 %v1648_v28, %v988_v7 }
 0x1f3   : > { %v997_v12 = vadd.f32 %v995_v48, %v967_v63  ;;  %v1013_v13 = vrot.slane %v1006_v62, 1  ;;  %v1046_v14 = vmul.f32 %v1649_v42, %v989_v50  ;;  %v1045_v15 = vmul.f32 %v1649_v42, %v988_v7  ;;  %v1133_v42 = vpop.permute.xlu0 %1132  ;;  %v1657_v62 = vld [vmem:[%s2395_s0 + $0x21] ss:$0 sm:$0xff]  ;;  %v1658_v63 = vld [vmem:[%s2395_s0 + $0x28] ss:$0 sm:$0xff] }
 0x1f4   : > { %v998_v16 = vadd.f32 %v996_v9, %v968_v6  ;;  %v1011_v19 = vrot.slane %v1005_v10, 1  ;;  %v1031_v20 = vrot.slane %v1025_v11, 2  ;;  %v1065_v22 = vmul.f32 %v1650_v46, %v988_v7 }
 0x1f5   : > { %v1070_v23 = vrot.slane %v1064_v59, 4  ;;  %v1033_v5 = vrot.slane %v1026_v4, 2  ;;  %v1066_v24 = vmul.f32 %v1650_v46, %v989_v50  ;;  %v1085_v25 = vmul.f32 %v1651_v47, %v988_v7  ;;  %v1270_v9 = vpop.permute.xlu1 %1269 }
 0x1f6   : > { %v1012_v49 = vsel %vm261_vm6, %v1010_v1, %v1011_v19  ;;  %v1014_v21 = vsel %vm261_vm6, %v1011_v19, %v1013_v13  ;;  %v1051_v26 = vrot.slane %v1045_v15, 3  ;;  %v1105_v27 = vmul.f32 %v1652_v55, %v988_v7 }
 0x1f7   : > { %v1090_v30 = vrot.slane %v2222_v61, 5  ;;  %v1086_v32 = vmul.f32 %v1651_v47, %v989_v50  ;;  %v1017_v33 = vadd.f32 %v1012_v49, %v997_v12  ;;  %v1018_v35 = vadd.f32 %v1014_v21, %v998_v16 }
 0x1f8   : > { %v1053_v34 = vrot.slane %v1046_v14, 3  ;;  %v1032_v36 = vsel %vm259_vm5, %v1030_v3, %v1031_v20  ;;  %v1034_v28 = vsel %vm259_vm5, %v1031_v20, %v1033_v5  ;;  %v1071_v29 = vrot.slane %v1065_v22, 4  ;;  %v1279_v14 = vpop.permute.xlu0 %1278  ;;  %v1659_v20 = vld [vmem:[%s2395_s0 + $0x2f] ss:$0 sm:$0xff] }
 0x1f9   : > { %v1073_v38 = vrot.slane %v1066_v24, 4  ;;  %v1106_v39 = vmul.f32 %v1652_v55, %v989_v50  ;;  %v1037_v40 = vadd.f32 %v1032_v36, %v1017_v33  ;;  %v1038_v41 = vadd.f32 %v1034_v28, %v1018_v35  ;;  %v1654_v55 = vld [vmem:[%s2395_s0 + $0xc] ss:$0 sm:$0xff]  ;;  %v1274_v28 = vpop.permute.xlu1 %1273 }
 0x1fa   : > { %v1052_v43 = vsel %vm257_vm4, %v1050_v8, %v1051_v26  ;;  %v1054_v44 = vsel %vm257_vm4, %v1051_v26, %v1053_v34  ;;  %v1091_v46 = vrot.slane %v1085_v25, 5  ;;  %v1111_v47 = vrot.slane %v1105_v27, 6 }
 0x1fb   : > { %v1110_v51 = vrot.slane %v2224_v2, 6  ;;  %v1057_v45 = vadd.f32 %v1052_v43, %v1037_v40  ;;  %v1058_v53 = vadd.f32 %v1054_v44, %v1038_v41  ;;  %v1137_v50 = vsel %vm384_vm9, %v1120_v57, %v2219_v56 }
 0x1fc   : > { %v1093_v58 = vrot.slane %v1086_v32, 5  ;;  %v1072_v48 = vsel %vm174_vm0, %v1070_v23, %v1071_v29  ;;  %v1074_v52 = vsel %vm174_vm0, %v1071_v29, %v1073_v38  ;;  %v1139_v59 = vsel %vm384_vm9, %v1124_v18, %v1133_v42  ;;  %v1272_v41 = vpop.permute.xlu0 %1271 }
 0x1fd   : > { %v1113_v56 = vrot.slane %v1106_v39, 6  ;;  %v1077_v57 = vadd.f32 %v1072_v48, %v1057_v45  ;;  %v1078_v61 = vadd.f32 %v1074_v52, %v1058_v53  ;;  %v1092_v1 = vsel %vm254_vm3, %v1090_v30, %v1091_v46 }
 0x1fe   : > { %v1094_v2 = vsel %vm254_vm3, %v1091_v46, %v1093_v58  ;;  %v1112_v0 = vsel %vm252_vm2, %v1110_v51, %v1111_v47  ;;  %v1145_v3 = vmul.f32 %v1653_v54, %v1137_v50  ;;  %v1154_v6 = vmul.f32 %v1654_v55, %v1137_v50 }
 0x1ff   : > { %v1097_v4 = vadd.f32 %v1092_v1, %v1077_v57  ;;  %v1156_v7 = vmul.f32 %v1654_v55, %v1139_v59  ;;  %v1098_v8 = vadd.f32 %v1094_v2, %v1078_v61  ;;  %v1174_v10 = vmul.f32 %v1655_v60, %v1137_v50  ;;  %v1281_v57 = vpop.permute.xlu1 %1280 }
 0x200   : > { %v1194_v11 = vmul.f32 %v1656_v37, %v1137_v50  ;;  %v1214_v12 = vmul.f32 %v1657_v62, %v1137_v50  ;;  %v2265_v13 = vmul.f32 %v1658_v63, %v1137_v50  ;;  %v1176_v18 = vmul.f32 %v1655_v60, %v1139_v59 }
 0x201   : > { %v1117_v15 = vadd.f32 %v1112_v0, %v1097_v4  ;;  %v1114_v16 = vsel %vm252_vm2, %v1111_v47, %v1113_v56  ;;  %v1138_v19 = vsel %vm384_vm9, %v2229_v17, %v1131_v31  ;;  %v1160_v49 = vrot.slane %v1154_v6, 1  ;;  %v1661_v0 = vld [vmem:[%s2395_s0 + $0xd] ss:$0 sm:$0xff] }
 0x202   : > { %v1118_v22 = vadd.f32 %v1114_v16, %v1098_v8  ;;  %v1146_v23 = vmul.f32 %v1653_v54, %v1138_v19  ;;  %v1155_v5 = vmul.f32 %v1654_v55, %v1138_v19  ;;  %v1175_v24 = vmul.f32 %v1655_v60, %v1138_v19 }
 0x203   : > { %v1147_v25 = vadd.f32 %v1145_v3, %v1117_v15  ;;  %v1163_v21 = vrot.slane %v1156_v7, 1  ;;  %v1195_v26 = vmul.f32 %v1656_v37, %v1138_v19  ;;  %v1215_v33 = vmul.f32 %v1657_v62, %v1138_v19  ;;  %v1662_v7 = vld [vmem:[%s2395_s0 + $0x14] ss:$0 sm:$0xff] }
 0x204   : > { %v1148_v27 = vadd.f32 %v1146_v23, %v1118_v22  ;;  %v1161_v30 = vrot.slane %v1155_v5, 1  ;;  %v1181_v32 = vrot.slane %v1175_v24, 2  ;;  %v1180_v35 = vrot.slane %v1174_v10, 2 }
 0x205   : > { %v1254_v34 = vmul.f32 %v1659_v20, %v1137_v50  ;;  %v1183_v36 = vrot.slane %v1176_v18, 2  ;;  %v1196_v17 = vmul.f32 %v1656_v37, %v1139_v59  ;;  %v1201_v39 = vrot.slane %v1195_v26, 3 }
 0x206   : > { %v1162_v29 = vsel %vm261_vm6, %v1160_v49, %v1161_v30  ;;  %v1164_v38 = vsel %vm261_vm6, %v1161_v30, %v1163_v21  ;;  %v1235_v40 = vmul.f32 %v1658_v63, %v1138_v19  ;;  %v1200_v42 = vrot.slane %v1194_v11, 3 }
 0x207   : > { %v1220_v31 = vrot.slane %v1214_v12, 4  ;;  %v1167_v43 = vadd.f32 %v1162_v29, %v1147_v25  ;;  %v1168_v44 = vadd.f32 %v1164_v38, %v1148_v27  ;;  %v1216_v46 = vmul.f32 %v1657_v62, %v1139_v59  ;;  %v1664_v27 = vld [vmem:[%s2395_s0 + $0x22] ss:$0 sm:$0xff] }
 0x208   : > { %v1182_v47 = vsel %vm259_vm5, %v1180_v35, %v1181_v32  ;;  %v1184_v51 = vsel %vm259_vm5, %v1181_v32, %v1183_v36  ;;  %v1221_v45 = vrot.slane %v1215_v33, 4  ;;  %v1236_v53 = vmul.f32 %v1658_v63, %v1139_v59  ;;  %v1283_v63 = vpop.permute.xlu0 %1282  ;;  %v1665_v35 = vld [vmem:[%s2395_s0 + $0x29] ss:$0 sm:$0xff] }
 0x209   : > { %v1187_v54 = vadd.f32 %v1182_v47, %v1167_v43  ;;  %v1188_v50 = vadd.f32 %v1184_v51, %v1168_v44  ;;  %v1255_v55 = vmul.f32 %v1659_v20, %v1138_v19  ;;  %v1203_v58 = vrot.slane %v1196_v17, 3  ;;  %v1666_v47 = vld [vmem:[%s2395_s0 + $0x30] ss:$0 sm:$0xff] }
 0x20a   : > { %v1256_v48 = vmul.f32 %v1659_v20, %v1139_v59  ;;  %v1202_v52 = vsel %vm257_vm4, %v1200_v42, %v1201_v39  ;;  %v1241_v60 = vrot.slane %v1235_v40, 5  ;;  %v1240_v37 = vrot.slane %v2265_v13, 5 }
 0x20b   : > { %v1207_v56 = vadd.f32 %v1202_v52, %v1187_v54  ;;  %v1260_v61 = vrot.slane %v1254_v34, 6  ;;  %v1204_v62 = vsel %vm257_vm4, %v1201_v39, %v1203_v58  ;;  %v1222_v1 = vsel %vm174_vm0, %v1220_v31, %v1221_v45 }
 0x20c   : > { %v1287_v2 = vsel %vm384_vm9, %v1270_v9, %v1279_v14  ;;  %v1223_v59 = vrot.slane %v1216_v46, 4  ;;  %v1208_v3 = vadd.f32 %v1204_v62, %v1188_v50  ;;  %v1261_v6 = vrot.slane %v1255_v55, 6  ;;  %v1660_v9 = vld [vmem:[%s2395_s0 + $0x6] ss:$0 sm:$0xff]  ;;  %v1663_v14 = vld [vmem:[%s2395_s0 + $0x1b] ss:$0 sm:$0xff] }
 0x20d   : > { %v1227_v4 = vadd.f32 %v1222_v1, %v1207_v56  ;;  %v1243_v8 = vrot.slane %v1236_v53, 5  ;;  %v1263_v10 = vrot.slane %v1256_v48, 6  ;;  %v1242_v11 = vsel %vm254_vm3, %v1240_v37, %v1241_v60 }
 0x20e   : > { %v1288_v12 = vsel %vm384_vm9, %v1272_v41, %v1281_v57  ;;  %v1304_v13 = vmul.f32 %v1661_v0, %v1287_v2  ;;  %v2297_v15 = vsel %vm384_vm9, %v1274_v28, %v1283_v63  ;;  %v1224_v19 = vsel %vm174_vm0, %v1221_v45, %v1223_v59 }
 0x20f   : > { %v1305_v18 = vmul.f32 %v1661_v0, %v1288_v12  ;;  %v1325_v16 = vmul.f32 %v1662_v7, %v1288_v12  ;;  %v1324_v20 = vmul.f32 %v1662_v7, %v1287_v2  ;;  %v1345_v22 = vmul.f32 %v1663_v14, %v1288_v12 }
 0x210   : > { %v1247_v23 = vadd.f32 %v1242_v11, %v1227_v4  ;;  %v1228_v5 = vadd.f32 %v1224_v19, %v1208_v3  ;;  %v1244_v24 = vsel %vm254_vm3, %v1241_v60, %v1243_v8  ;;  %v1262_v49 = vsel %vm252_vm2, %v1260_v61, %v1261_v6 }
 0x211   : > { %v1311_v25 = vrot.slane %v1305_v18, 1  ;;  %v1295_v21 = vmul.f32 %v1660_v9, %v1287_v2  ;;  %v1344_v26 = vmul.f32 %v1663_v14, %v1287_v2  ;;  %v1306_v30 = vmul.f32 %v1661_v0, %v2297_v15 }
 0x212   : > { %v1267_v32 = vadd.f32 %v1262_v49, %v1247_v23  ;;  %v1310_v33 = vrot.slane %v1304_v13, 1  ;;  %v1326_v34 = vmul.f32 %v1662_v7, %v2297_v15  ;;  %v1331_v36 = vrot.slane %v1325_v16, 2 }
 0x213   : > { %v1365_v17 = vmul.f32 %v1664_v27, %v1288_v12  ;;  %v1330_v28 = vrot.slane %v1324_v20, 2  ;;  %v1296_v29 = vmul.f32 %v1660_v9, %v1288_v12  ;;  %v1351_v38 = vrot.slane %v1345_v22, 3 }
 0x214   : > { %v1297_v39 = vadd.f32 %v1295_v21, %v1267_v32  ;;  %v1312_v40 = vsel %vm261_vm6, %v1310_v33, %v1311_v25  ;;  %v1364_v41 = vmul.f32 %v1664_v27, %v1287_v2  ;;  %v1385_v42 = vmul.f32 %v1665_v35, %v1288_v12 }
 0x215   : > { %v1248_v31 = vadd.f32 %v1244_v24, %v1228_v5  ;;  %v1350_v44 = vrot.slane %v1344_v26, 3  ;;  %v1384_v46 = vmul.f32 %v1665_v35, %v1287_v2  ;;  %v1264_v51 = vsel %vm252_vm2, %v1261_v6, %v1263_v10 }
 0x216   : > { %v1317_v43 = vadd.f32 %v1312_v40, %v1297_v39  ;;  %v1332_v45 = vsel %vm259_vm5, %v1330_v28, %v1331_v36  ;;  %v1371_v53 = vrot.slane %v1365_v17, 4  ;;  %v1405_v54 = vmul.f32 %v1666_v47, %v1288_v12 }
 0x217   : > { %v1268_v50 = vadd.f32 %v1264_v51, %v1248_v31  ;;  %v1313_v55 = vrot.slane %v1306_v30, 1  ;;  %v1346_v58 = vmul.f32 %v1663_v14, %v2297_v15  ;;  %v1352_v52 = vsel %vm257_vm4, %v1350_v44, %v1351_v38 }
 0x218   : > { %v1337_v48 = vadd.f32 %v1332_v45, %v1317_v43  ;;  %v1370_v60 = vrot.slane %v1364_v41, 4  ;;  %v1391_v37 = vrot.slane %v1385_v42, 5  ;;  %v1404_v56 = vmul.f32 %v1666_v47, %v1287_v2 }
 0x219   : > { %v1298_v57 = vadd.f32 %v1296_v29, %v1268_v50  ;;  %v1333_v61 = vrot.slane %v1326_v34, 2  ;;  %v1366_v62 = vmul.f32 %v1664_v27, %v2297_v15  ;;  %v1314_v63 = vsel %vm261_vm6, %v1311_v25, %v1313_v55 }
 0x21a   : > { %v1357_v1 = vadd.f32 %v1352_v52, %v1337_v48  ;;  %v1372_v0 = vsel %vm174_vm0, %v1370_v60, %v1371_v53  ;;  %v1390_v59 = vrot.slane %v1384_v46, 5  ;;  %v1411_v3 = vrot.slane %v1405_v54, 6 }
 0x21b   : > { %v1318_v4 = vadd.f32 %v1314_v63, %v1298_v57  ;;  %v1353_v6 = vrot.slane %v1346_v58, 3  ;;  %v1386_v7 = vmul.f32 %v1665_v35, %v2297_v15  ;;  %v1334_v10 = vsel %vm259_vm5, %v1331_v36, %v1333_v61 }
 0x21c   : > { %v1377_v8 = vadd.f32 %v1372_v0, %v1357_v1  ;;  %v1392_v2 = vsel %vm254_vm3, %v1390_v59, %v1391_v37  ;;  %v1410_v11 = vrot.slane %v1404_v56, 6  ;;  %v1373_v9 = vrot.slane %v1366_v62, 4 }
 0x21d   : > { %v1338_v12 = vadd.f32 %v1334_v10, %v1318_v4  ;;  %v1354_v14 = vsel %vm257_vm4, %v1351_v38, %v1353_v6  ;;  %v1406_v18 = vmul.f32 %v1666_v47, %v2297_v15  ;;  %v1393_v20 = vrot.slane %v1386_v7, 5 }
 0x21e   : > { %v1397_v13 = vadd.f32 %v1392_v2, %v1377_v8  ;;  %v1412_v16 = vsel %vm252_vm2, %v1410_v11, %v1411_v3  ;;  %v1374_v23 = vsel %vm174_vm0, %v1371_v53, %v1373_v9  ;;  %v1430_v15 = vstv %s1429_s11 }
 0x21f   : > { %v1358_v19 = vadd.f32 %v1354_v14, %v1338_v12  ;;  %v1394_v24 = vsel %vm254_vm3, %v1391_v37, %v1393_v20  ;;  %v1413_v25 = vrot.slane %v1406_v18, 6  ;;  %v1523_v0 = vlaneseq }
 0x220   : > { %v1417_v22 = vadd.f32 %v1412_v16, %v1397_v13 }
 0x221   : > { %v1378_v5 = vadd.f32 %v1374_v23, %v1358_v19  ;;  %v1414_v21 = vsel %vm252_vm2, %v1411_v3, %v1413_v25  ;;  %v1524_v7 = vshrl.u32 %v1523_v0, 7 }
 0x222   : > { %1421 = vrot.lane.b32.xlu1 %v1417_v22, %s1808_s4 }
 0x223   : > { %v1398_v49 = vadd.f32 %v1394_v24, %v1378_v5  ;;  %v1525_v18 = vsub.s32 0, %v1524_v7 }
 0x225   : > { %v1418_v26 = vadd.f32 %v1414_v21, %v1398_v49 }
 0x227   : > { %1423 = vrot.lane.b32.xlu0 %v1418_v26, %s1808_s4 }
 0x294   : > { %v1422_v27 = vpop.permute.xlu1 %1421 }
 0x295   : > { %v1427_v30 = vadd.f32 %v1422_v27, %v1417_v22 }
 0x297   : > { %v1431_v32 = vadd.f32 %v1430_v15, %v1427_v30 }
 0x299   : > { %v1667_v33 = vmul.f32 -1.442695, %v1431_v32  ;;  %v1424_v35 = vpop.permute.xlu0 %1423 }
 0x29a   : > { %v1428_v34 = vadd.f32 %v1424_v35, %v1418_v26  ;;  %v1744_v26 = vld [vmem:[%s1904_s29] sm:$0xff] }
 0x29b   : > { %1736 = vpow2.f32 %v1667_v33 }
 0x29c   : > { %v1432_v36 = vadd.f32 %v1430_v15, %v1428_v34 }
 0x29e   : > { %v1668_v17 = vmul.f32 -1.442695, %v1432_v36 }
 0x2a0   : > { %1738 = vpow2.f32 %v1668_v17 }
 0x2a8   : > { %v1737_v28 = vpop.eup %1736 }
 0x2a9   : > { %v1439_v29 = vadd.f32 1.0, %v1737_v28 }
 0x2ab   : > { %1740 = vrcp.f32 %v1439_v29 }
 0x2ad   : > { %v1739_v38 = vpop.eup %1738 }
 0x2ae   : > { %v1440_v39 = vadd.f32 1.0, %v1739_v38 }
 0x2b0   : > { %1742 = vrcp.f32 %v1440_v39 }
 0x2b8   : > { %v1741_v40 = vpop.eup %1740 }
 0x2b9   : > { %v1446_v41 = vrot.slane %v1741_v40, 1  ;;  %v1450_v31 = vrot.slane %v1741_v40, 2  ;;  %v1454_v44 = vrot.slane %v1741_v40, 3  ;;  %v1458_v47 = vrot.slane %v1741_v40, 4 }
 0x2ba   : > { %v1462_v45 = vrot.slane %v1741_v40, 5  ;;  %v1466_v54 = vrot.slane %v1741_v40, 6  ;;  %v1470_v55 = vrot.slane %v1741_v40, 7 }
 0x2bb   : > { %1447 = vrot.lane.b32.xlu1 %v1446_v41, %s1813_s9 }
 0x2bd   : > { %v1743_v42 = vpop.eup %1742 }
 0x2be   : > { %v1475_v43 = vrot.slane %v1743_v42, 1  ;;  %v1479_v46 = vrot.slane %v1743_v42, 2  ;;  %v1483_v51 = vrot.slane %v1743_v42, 3  ;;  %v1487_v53 = vrot.slane %v1743_v42, 4 }
 0x2bf   : > { %1451 = vrot.lane.b32.xlu1 %v1450_v31, %s1812_s8  ;;  %v1491_v50 = vrot.slane %v1743_v42, 5  ;;  %v1495_v58 = vrot.slane %v1743_v42, 6  ;;  %v1499_v48 = vrot.slane %v1743_v42, 7 }
 0x2c0   : > { %1476 = vrot.lane.b32.xlu0 %v1475_v43, %s1813_s9 }
 0x2c3   : > { %1455 = vrot.lane.b32.xlu1 %v1454_v44, %s1811_s7 }
 0x2c4   : > { %1480 = vrot.lane.b32.xlu0 %v1479_v46, %s1812_s8 }
 0x2c7   : > { %1459 = vrot.lane.b32.xlu1 %v1458_v47, %s1810_s6 }
 0x2c8   : > { %1484 = vrot.lane.b32.xlu0 %v1483_v51, %s1811_s7 }
 0x2cb   : > { %1463 = vrot.lane.b32.xlu1 %v1462_v45, %s1809_s5 }
 0x2cc   : > { %1488 = vrot.lane.b32.xlu0 %v1487_v53, %s1810_s6 }
 0x2cf   : > { %1467 = vrot.lane.b32.xlu1 %v1466_v54, %s1807_s30 }
 0x2d0   : > { %1492 = vrot.lane.b32.xlu0 %v1491_v50, %s1809_s5  ;;  %s1675_s5 = sshll.u32 %s1872_s1, 7  ;;  %s1751_s1 = scalar_lea.vmem %s1750_s21, 256 }
 0x2d1   : > { %s1550_s12 = scalar_lea.hbm %s2398_s3, %s1675_s5 }
 0x2d3   : > { %1471 = vrot.lane.b32.xlu1 %v1470_v55, %s1808_s4 }
 0x2d4   : > { %1496 = vrot.lane.b32.xlu0 %v1495_v58, %s1807_s30  ;;  %s162_s30 = sand.u32 1, %s1797_s15  }
 0x2d5   : > { %s1538_s13 = scalar_lea.sflag [#allocation4], %s162_s30 }
 0x2d8   : > { %1500 = vrot.lane.b32.xlu0 %v1499_v48, %s1808_s4  ;;  %s1615_s4 = sshll.u32 %s162_s30, 3 }
 0x2d9   : > { %s164_s6 = scalar_lea.vmem [#allocation3], %s1615_s4 }
 0x2da   : > { %s1552_s7 = sshll.u32 %s164_s6, 4  ;;  %s1553_s7 = int_to_ptr.vmem [resolvable:$true] %s1552_s7 }
 0x2db   : > { %s1745_s18 = scalar_lea.vmem %s1553_s7, 128  ;;  %p1752_p0 = scmp.lt.s32.totalorder %s1553_s7, %s1750_s21 }
 0x2dc   : > { %p1746_p11 = scmp.ne.s32.totalorder %s1553_s7, %s1745_s18  ;;  %p1753_p1 = scmp.lt.s32.totalorder %s1751_s1, %s1745_s18 }
 0x2de   : > { %p1747_p12 = pnand %p1746_p11, %p1889_p5  ;;  %p1754_p2 = por %p1753_p1, %p1752_p0 }
 0x2e0   : > { %p1748_p13 = pneg %p1747_p12 }
 0x2e2   : > { %p1755_p3 = pnand %p1754_p2, %p1748_p13 }
 0x32d   : > { %v1448_v52 = vpop.permute.xlu1 %1447 }
 0x32e   : > { %v1503_v59 = vsel %vm384_vm9, %v1741_v40, %v1448_v52 }
 0x331   : > { %v1452_v60 = vpop.permute.xlu1 %1451 }
 0x332   : > { %v1477_v37 = vpop.permute.xlu0 %1476  ;;  %v1505_v4 = vsel %vm1504_vm10, %v1503_v59, %v1452_v60 }
 0x333   : > { %v1516_v2 = vsel %vm384_vm9, %v1743_v42, %v1477_v37 }
 0x335   : > { %v1456_v56 = vpop.permute.xlu1 %1455 }
 0x336   : > { %v1481_v57 = vpop.permute.xlu0 %1480  ;;  %v1507_v8 = vsel %vm1506_vm11, %v1505_v4, %v1456_v56 }
 0x337   : > { %v1517_v9 = vsel %vm1504_vm10, %v1516_v2, %v1481_v57 }
 0x339   : > { %v1460_v61 = vpop.permute.xlu1 %1459 }
 0x33a   : > { %v1485_v62 = vpop.permute.xlu0 %1484  ;;  %v1509_v10 = vsel %vm1508_vm12, %v1507_v8, %v1460_v61 }
 0x33b   : > { %v1518_v16 = vsel %vm1506_vm11, %v1517_v9, %v1485_v62 }
 0x33d   : > { %v1464_v1 = vpop.permute.xlu1 %1463 }
 0x33e   : > { %v1489_v63 = vpop.permute.xlu0 %1488  ;;  %v1511_v11 = vsel %vm1510_vm13, %v1509_v10, %v1464_v1 }
 0x33f   : > { %v1519_v20 = vsel %vm1508_vm12, %v1518_v16, %v1489_v63 }
 0x341   : > { %v1468_v3 = vpop.permute.xlu1 %1467 }
 0x342   : > { %v1493_v6 = vpop.permute.xlu0 %1492  ;;  %v1513_v13 = vsel %vm1512_vm14, %v1511_v11, %v1468_v3 }
 0x343   : > { %v1520_v22 = vsel %vm1510_vm13, %v1519_v20, %v1493_v6 }
 0x345   : > { %v1472_v12 = vpop.permute.xlu1 %1471 }
 0x346   : > { %v1497_v14 = vpop.permute.xlu0 %1496  ;;  %v1515_v19 = vsel %vm1514_vm15, %v1513_v13, %v1472_v12 }
 0x347   : > { %v1521_v23 = vsel %vm1512_vm14, %v1520_v22, %v1497_v14  ;;  %v1526_v5 = vrot.slane %v1515_v19, %v1525_v18 }
 0x34a   : > { %v1501_v24 = vpop.permute.xlu0 %1500 }
 0x34b   : > { %v1522_v25 = vsel %vm1514_vm15, %v1521_v23, %v1501_v24 }
 0x34c   : > { %v1530_v49 = vrot.slane %v1522_v25, %v1525_v18 }
 0x34e   : > { %v1533_v21 = vcombine.low %v1526_v5, %v1530_v49 }
 0x350   : > { %v1535_v15 = vmul.f32 %v1744_v26, %v1533_v21 }
 0x352   : > { %1536 = vst [vmem:[%s164_s6] sm:$0xff] %v1535_v15 }
 0x353   : > { %1758 = shalt.err (!%p1755_p3)
}
 0x354   : > { %s1759_s29 = scalar_lea.hbm %s1550_s12, 128  ;;  %s1763_s27 = scalar_lea.hbm %s2398_s3, 256 }
 0x355   : > { %p1760_p4 = scmp.ne.s32.totalorder %s1550_s12, %s1759_s29  ;;  %p1764_p9 = scmp.lt.s32.totalorder %s1550_s12, %s2398_s3 }
 0x356   : > { %p1765_p10 = scmp.lt.s32.totalorder %s1763_s27, %s1759_s29 }
 0x357   : > { %p1761_p7 = pnand %p1760_p4, %p1889_p5 }
 0x358   : > { %p1766_p11 = por %p1765_p10, %p1764_p9 }
 0x359   : > { %p1762_p8 = pneg %p1761_p7 }
 0x35b   : > { %p1767_p12 = pnand %p1766_p11, %p1762_p8 }
 0x35d   : > { %1770 = shalt.err (!%p1767_p12)
}
 0x35e   : > { %1676 = dma.vmem_to_hbm [thread:$0]  (%p1889_p5), %s1553_s7, 128, %s1550_s12, %s1538_s13  }
 0x35f PF: > { %p1682_p13 = scmp.ge.s32.totalorder %s1805_s17, 2  ;;  %s1564_s11 = sand.u32 1, %s1793_s14  }
 0x360   : > { %s1565_s30 = scalar_lea.sflag [#allocation4], %s1564_s11 }
 0x361   : > { %p1679_p0 = pnand %p1682_p13, %p1893_p6 }
 0x363   : > { %p1680_p1 = pneg %p1679_p0 }
 0x365   : > { %1788 = dma.done.wait (%p1680_p1), %s1565_s30, 128  }
 0x366   : > { %1790 = vsyncadd (%p1680_p1), %s1565_s30, 4294967168  ;;  %p14_p2 = scmp.ge.s32.totalorder %s1876_s19, 4   ;;  %s2401_s14 = smov %s1797_s15 }
 0x367   : > { %s2402_s15 = smov %s1801_s16  ;;  %s2403_s16 = smov %s1887_s22 }
 0x368   : > { %s2404_s17 = smov %s1876_s19  ;;  %16 = sbr.rel (!%p14_p2) target bundleno = 5 (0x5), region = 67 }
 0x36d   :  { %1570 = vsyncpa [#allocation4], 1 }
 0x36e   :  { %1572 = vsyncpa [#allocation4 + $0x1], 1 }

</bundles_post_ra>
